<compile_context>
chip_gen: v7x
topology: tpu7x:2x2x1
jax: 0.10.0
libtpu: 0.0.40
codegen_flags: <defaults>
</compile_context>

<pallas_src>
import functools

import jax
import jax.numpy as jnp
from jax.experimental import pallas as pl
from jax.experimental.pallas import tpu as pltpu

LANE = 128


def _round_up(n, m):
    return (n + m - 1) // m * m


def _temporal_block_kernel(*refs, K, dilation, T, has_downsample):
    """Fused TemporalBlock for one batch row:
         h1  = relu(causal_dilated_conv(x,  w1) + b1)
         h2  = relu(causal_dilated_conv(h1, w2) + b2)
         res = x (identity) or x @ wd + bd (1x1 downsample)
         out = relu(h2 + res)
    Causal left-padding lives in VMEM scratch; nothing intermediate hits HBM."""
    if has_downsample:
        (x_ref, w1_ref, b1_ref, w2_ref, b2_ref, wd_ref, bd_ref,
         o_ref, xpad, h1pad) = refs
    else:
        (x_ref, w1_ref, b1_ref, w2_ref, b2_ref,
         o_ref, xpad, h1pad) = refs

    pad = (K - 1) * dilation
    cin = xpad.shape[-1]
    cout = o_ref.shape[-1]

    x = x_ref[0]  # (T, Cin_p)

    # Stage x into a causally left-padded VMEM scratch (replaces the implicit
    # zeros of torch Conv1d(padding=pad) + Chomp1d(pad)).
    xpad[pl.ds(0, pad), :] = jnp.zeros((pad, cin), xpad.dtype)
    xpad[pl.ds(pad, T), :] = x.astype(xpad.dtype)

    # conv1: K dilated taps, each a full-lane-width MXU matmul, f32 accumulate.
    acc = jnp.zeros((T, cout), jnp.float32)
    for k in range(K):  # K is a small static int -> unrolled taps
        acc = acc + jnp.dot(xpad[pl.ds(k * dilation, T), :], w1_ref[k],
                            preferred_element_type=jnp.float32)
    h1 = jnp.maximum(acc + b1_ref[0], 0.0)

    # Stage h1 (left-padded) so conv2 reads straight out of VMEM.
    h1pad[pl.ds(0, pad), :] = jnp.zeros((pad, cout), h1pad.dtype)
    h1pad[pl.ds(pad, T), :] = h1.astype(h1pad.dtype)

    # conv2
    acc = jnp.zeros((T, cout), jnp.float32)
    for k in range(K):
        acc = acc + jnp.dot(h1pad[pl.ds(k * dilation, T), :], w2_ref[k],
                            preferred_element_type=jnp.float32)
    h2 = jnp.maximum(acc + b2_ref[0], 0.0)

    # Residual path: identity or fused 1x1 conv.
    if has_downsample:
        res = jnp.dot(x, wd_ref[0], preferred_element_type=jnp.float32) + bd_ref[0]
    else:
        res = x.astype(jnp.float32)

    o_ref[0] = jnp.maximum(h2 + res, 0.0).astype(o_ref.dtype)
    # TODO(synk): dropout layers are training-only stochastic ops; treated as
    # identity (inference semantics).


def temporal_block(x, p, dilation):
    """One fused TemporalBlock.  x: (B, T, Cin_p) lane-padded channels-last.
    p: lane-padded params.  Returns (B, T, Cout_p)."""
    B, T, Cp_in = x.shape
    K = p["w1"].shape[0]
    Cp_out = p["w1"].shape[-1]
    pad = (K - 1) * dilation
    has_ds = p.get("wd") is not None

    kern = functools.partial(_temporal_block_kernel, K=K, dilation=dilation,
                             T=T, has_downsample=has_ds)

    in_specs = [
        pl.BlockSpec((1, T, Cp_in), lambda i: (i, 0, 0)),        # x: one batch row
        pl.BlockSpec((K, Cp_in, Cp_out), lambda i: (0, 0, 0)),   # w1 (resident)
        pl.BlockSpec((1, Cp_out), lambda i: (0, 0)),             # b1
        pl.BlockSpec((K, Cp_out, Cp_out), lambda i: (0, 0, 0)),  # w2 (resident)
        pl.BlockSpec((1, Cp_out), lambda i: (0, 0)),             # b2
    ]
    args = [x, p["w1"], p["b1"], p["w2"], p["b2"]]
    if has_ds:
        in_specs += [
            pl.BlockSpec((1, Cp_in, Cp_out), lambda i: (0, 0, 0)),   # wd (resident)
            pl.BlockSpec((1, Cp_out), lambda i: (0, 0)),             # bd
        ]
        args += [p["wd"], p["bd"]]

    flops = 2 * B * T * K * (Cp_in + Cp_out) * Cp_out
    if has_ds:
        flops += 2 * B * T * Cp_in * Cp_out
    bytes_accessed = 4 * (B * T * (Cp_in + Cp_out)
                          + K * Cp_out * (Cp_in + Cp_out) + 2 * Cp_out)

    return pl.pallas_call(
        kern,
        out_shape=jax.ShapeDtypeStruct((B, T, Cp_out), x.dtype),
        grid_spec=pltpu.PrefetchScalarGridSpec(
            num_scalar_prefetch=0,
            grid=(B,),
            in_specs=in_specs,
            out_specs=pl.BlockSpec((1, T, Cp_out), lambda i: (i, 0, 0)),
            scratch_shapes=[
                pltpu.VMEM((T + pad, Cp_in), jnp.float32),   # causally padded x
                pltpu.VMEM((T + pad, Cp_out), jnp.float32),  # causally padded h1
            ],
        ),
        compiler_params=pltpu.CompilerParams(
            dimension_semantics=("parallel",)),
        cost_estimate=pl.CostEstimate(flops=flops, transcendentals=0,
                                      bytes_accessed=bytes_accessed),
    )(*args)


# ---------------------------------------------------------------------------
# Parameters (synthetic deterministic init; shapes mirror TemporalConvNet).
# ---------------------------------------------------------------------------
def init_tcn_params(key, input_size, num_channels, kernel_size):
    params = []
    for i, cout in enumerate(num_channels):
        cin = input_size if i == 0 else num_channels[i - 1]
        key, k1, k2, k3, k4, k5, k6 = jax.random.split(key, 7)
        s1 = 1.0 / jnp.sqrt(jnp.float32(cin * kernel_size))
        s2 = 1.0 / jnp.sqrt(jnp.float32(cout * kernel_size))
        p = {
            "w1": jax.random.normal(k1, (kernel_size, cin, cout), jnp.float32) * s1,
            "b1": jax.random.normal(k2, (cout,), jnp.float32) * s1,
            "w2": jax.random.normal(k3, (kernel_size, cout, cout), jnp.float32) * s2,
            "b2": jax.random.normal(k4, (cout,), jnp.float32) * s2,
        }
        if cin != cout:
            sd = 1.0 / jnp.sqrt(jnp.float32(cin))
            p["wd"] = jax.random.normal(k5, (1, cin, cout), jnp.float32) * sd
            p["bd"] = jax.random.normal(k6, (cout,), jnp.float32) * sd
        else:
            p["wd"] = None
            p["bd"] = None
        params.append(p)
    return params


def _pad_to(a, shape):
    return jnp.pad(a, [(0, n - s) for s, n in zip(a.shape, shape)])


def prepare_padded_params(params):
    """Zero-pad channel dims to multiples of 128 (lane-dense layout).  Padded
    lanes stay exactly zero through every block, so results are unchanged."""
    out = []
    for p in params:
        K, cin, cout = p["w1"].shape
        cp_in = _round_up(cin, LANE)
        cp_out = _round_up(cout, LANE)
        pp = {
            "w1": _pad_to(p["w1"], (K, cp_in, cp_out)),
            "b1": _pad_to(p["b1"].reshape(1, cout), (1, cp_out)),
            "w2": _pad_to(p["w2"], (K, cp_out, cp_out)),
            "b2": _pad_to(p["b2"].reshape(1, cout), (1, cp_out)),
            "wd": None if p["wd"] is None else _pad_to(p["wd"], (1, cp_in, cp_out)),
            "bd": None if p["bd"] is None else _pad_to(p["bd"].reshape(1, cout), (1, cp_out)),
        }
        out.append(pp)
    return out


def tcn_pre_forward(x, padded_params, out_channels):
    """TCN_pre.forward: transpose(1,2) -> TemporalConvNet -> transpose(1,2).
    Channels-last kernel layout makes the two transposes cancel.
    x: (B, T, input_size) -> (B, T, out_channels)."""
    B, T, cin = x.shape
    cp_in = padded_params[0]["w1"].shape[1]
    h = jnp.pad(x, ((0, 0), (0, 0), (0, cp_in - cin)))  # one-time lane pad
    for i, p in enumerate(padded_params):
        h = temporal_block(h, p, dilation=2 ** i)
    return h[:, :, :out_channels]


# ---------------------------------------------------------------------------
# Pure-JAX reference (inference semantics) for validation.
# ---------------------------------------------------------------------------
def _ref_causal_conv(x, w, b, dilation):
    K = w.shape[0]
    pad = (K - 1) * dilation
    T = x.shape[1]
    xp = jnp.pad(x, ((0, 0), (pad, 0), (0, 0)))
    acc = jnp.zeros((x.shape[0], T, w.shape[2]), jnp.float32)
    for k in range(K):
        acc = acc + jnp.einsum("btc,cd->btd",
                               xp[:, k * dilation:k * dilation + T, :], w[k],
                               precision=jax.lax.Precision.HIGHEST)
    return acc + b


def _reference_forward(x, params):
    h = x
    for i, p in enumerate(params):
        d = 2 ** i
        h1 = jax.nn.relu(_ref_causal_conv(h, p["w1"], p["b1"], d))
        h2 = jax.nn.relu(_ref_causal_conv(h1, p["w2"], p["b2"], d))
        res = h if p["wd"] is None else _ref_causal_conv(h, p["wd"], p["bd"], 1)
        h = jax.nn.relu(h2 + res)
    return h


if __name__ == "__main__":
    # Small shapes consistent with the module: (batch, seq_len, input_size)
    batch, seq_len, input_size = 2, 16, 4
    num_channels = [8, 8]          # two TemporalBlocks, dilations 1 and 2
    kernel_size = 3
    dropout = 0.2                  # identity at inference

    key = jax.random.PRNGKey(0)
    key, kx = jax.random.split(key)
    x = jax.random.normal(kx, (batch, seq_len, input_size), jnp.float32)

    params = init_tcn_params(key, input_size, num_channels, kernel_size)
    padded_params = prepare_padded_params(params)

    fwd = jax.jit(functools.partial(tcn_pre_forward,
                                    out_channels=num_channels[-1]))
    out = jax.block_until_ready(fwd(x, padded_params))

    assert out.shape == (batch, seq_len, num_channels[-1]), out.shape
    assert jnp.all(jnp.isfinite(out))

    ref = _reference_forward(x, params)
    max_err = float(jnp.max(jnp.abs(out - ref)))
    assert jnp.allclose(out, ref, atol=1e-2, rtol=1e-2), max_err

    print("KERNEL_OK")
</pallas_src>

<mosaic_0001>
module attributes {stable_mosaic.version = 11 : i64} {
  func.func @_temporal_block_kernel(%arg0: i32, %arg1: memref<1x16x128xf32, #tpu.memory_space<vmem>>, %arg2: memref<3x128x128xf32, #tpu.memory_space<vmem>>, %arg3: memref<1x128xf32, #tpu.memory_space<vmem>>, %arg4: memref<3x128x128xf32, #tpu.memory_space<vmem>>, %arg5: memref<1x128xf32, #tpu.memory_space<vmem>>, %arg6: memref<1x16x128xf32, #tpu.memory_space<vmem>>, %arg7: memref<20x128xf32, #tpu.memory_space<vmem>>, %arg8: memref<20x128xf32, #tpu.memory_space<vmem>>) attributes {dimension_semantics = [#tpu.dimension_semantics<parallel>], iteration_bounds = array<i64: 2>, scalar_prefetch = 0 : i64, scratch_operands = 2 : i64, tpu.core_type = #tpu.core_type<tc>, window_params = [{transform_indices = @transform_0, window_bounds = array<i64: 1, 16, 128>}, {pipeline_mode = #tpu.pipeline_mode<synchronous>, transform_indices = @transform_1, window_bounds = array<i64: 3, 128, 128>}, {pipeline_mode = #tpu.pipeline_mode<synchronous>, transform_indices = @transform_2, window_bounds = array<i64: 1, 128>}, {pipeline_mode = #tpu.pipeline_mode<synchronous>, transform_indices = @transform_3, window_bounds = array<i64: 3, 128, 128>}, {pipeline_mode = #tpu.pipeline_mode<synchronous>, transform_indices = @transform_4, window_bounds = array<i64: 1, 128>}, {transform_indices = @transform_5, window_bounds = array<i64: 1, 16, 128>}]} {
    %c0 = arith.constant 0 : index
    %c0_0 = arith.constant 0 : index
    %c0_1 = arith.constant 0 : index
    %0 = vector.load %arg1[%c0, %c0_0, %c0_1] : memref<1x16x128xf32, #tpu.memory_space<vmem>>, vector<1x16x128xf32>
    %1 = vector.shape_cast %0 : vector<1x16x128xf32> to vector<16x128xf32>
    %cst = arith.constant 0.000000e+00 : f32
    %2 = vector.broadcast %cst : f32 to vector<4x128xf32>
    %c0_2 = arith.constant 0 : index
    %c0_3 = arith.constant 0 : index
    %3 = vector.load %arg7[%c0_2, %c0_3] : memref<20x128xf32, #tpu.memory_space<vmem>>, vector<4x128xf32>
    tpu.vector_store %arg7[%c0_2, %c0_3], %2 {strides = array<i32>} : memref<20x128xf32, #tpu.memory_space<vmem>>, vector<4x128xf32>,
    %c4 = arith.constant 4 : index
    %c0_4 = arith.constant 0 : index
    %4 = vector.load %arg7[%c4, %c0_4] : memref<20x128xf32, #tpu.memory_space<vmem>>, vector<16x128xf32>
    tpu.vector_store %arg7[%c4, %c0_4], %1 {strides = array<i32>} : memref<20x128xf32, #tpu.memory_space<vmem>>, vector<16x128xf32>,
    %cst_5 = arith.constant 0.000000e+00 : f32
    %5 = vector.broadcast %cst_5 : f32 to vector<16x128xf32>
    %c0_6 = arith.constant 0 : index
    %c0_7 = arith.constant 0 : index
    %6 = vector.load %arg7[%c0_6, %c0_7] : memref<20x128xf32, #tpu.memory_space<vmem>>, vector<16x128xf32>
    %c0_8 = arith.constant 0 : index
    %c0_9 = arith.constant 0 : index
    %c0_10 = arith.constant 0 : index
    %7 = vector.load %arg2[%c0_8, %c0_9, %c0_10] : memref<3x128x128xf32, #tpu.memory_space<vmem>>, vector<1x128x128xf32>
    %8 = vector.shape_cast %7 : vector<1x128x128xf32> to vector<128x128xf32>
    %cst_11 = arith.constant dense<0.000000e+00> : vector<16x128xf32>
    %9 = tpu.matmul %6, %8, %cst_11 {dimension_numbers = #tpu.dot_dimension_numbers<[1], [0], [0], [1], [0, 0, 1, 1], [], []>} : vector<16x128xf32>, vector<128x128xf32>, vector<16x128xf32> -> vector<16x128xf32>
    %10 = arith.addf %5, %9 : vector<16x128xf32>
    %c2 = arith.constant 2 : index
    %c0_12 = arith.constant 0 : index
    %11 = vector.load %arg7[%c2, %c0_12] : memref<20x128xf32, #tpu.memory_space<vmem>>, vector<16x128xf32>
    %c1 = arith.constant 1 : index
    %c0_13 = arith.constant 0 : index
    %c0_14 = arith.constant 0 : index
    %12 = vector.load %arg2[%c1, %c0_13, %c0_14] : memref<3x128x128xf32, #tpu.memory_space<vmem>>, vector<1x128x128xf32>
    %13 = vector.shape_cast %12 : vector<1x128x128xf32> to vector<128x128xf32>
    %cst_15 = arith.constant dense<0.000000e+00> : vector<16x128xf32>
    %14 = tpu.matmul %11, %13, %cst_15 {dimension_numbers = #tpu.dot_dimension_numbers<[1], [0], [0], [1], [0, 0, 1, 1], [], []>} : vector<16x128xf32>, vector<128x128xf32>, vector<16x128xf32> -> vector<16x128xf32>
    %15 = arith.addf %10, %14 : vector<16x128xf32>
    %c4_16 = arith.constant 4 : index
    %c0_17 = arith.constant 0 : index
    %16 = vector.load %arg7[%c4_16, %c0_17] : memref<20x128xf32, #tpu.memory_space<vmem>>, vector<16x128xf32>
    %c2_18 = arith.constant 2 : index
    %c0_19 = arith.constant 0 : index
    %c0_20 = arith.constant 0 : index
    %17 = vector.load %arg2[%c2_18, %c0_19, %c0_20] : memref<3x128x128xf32, #tpu.memory_space<vmem>>, vector<1x128x128xf32>
    %18 = vector.shape_cast %17 : vector<1x128x128xf32> to vector<128x128xf32>
    %cst_21 = arith.constant dense<0.000000e+00> : vector<16x128xf32>
    %19 = tpu.matmul %16, %18, %cst_21 {dimension_numbers = #tpu.dot_dimension_numbers<[1], [0], [0], [1], [0, 0, 1, 1], [], []>} : vector<16x128xf32>, vector<128x128xf32>, vector<16x128xf32> -> vector<16x128xf32>
    %20 = arith.addf %15, %19 : vector<16x128xf32>
    %c0_22 = arith.constant 0 : index
    %c0_23 = arith.constant 0 : index
    %21 = vector.load %arg3[%c0_22, %c0_23] : memref<1x128xf32, #tpu.memory_space<vmem>>, vector<1x128xf32>
    %22 = vector.shape_cast %21 : vector<1x128xf32> to vector<128xf32>
    %23 = vector.shape_cast %22 : vector<128xf32> to vector<1x128xf32>
    %24 = vector.broadcast %23 : vector<1x128xf32> to vector<16x128xf32>
    %25 = arith.addf %20, %24 : vector<16x128xf32>
    %cst_24 = arith.constant 0.000000e+00 : f32
    %26 = vector.broadcast %cst_24 : f32 to vector<16x128xf32>
    %27 = arith.maximumf %25, %26 : vector<16x128xf32>
    %cst_25 = arith.constant 0.000000e+00 : f32
    %28 = vector.broadcast %cst_25 : f32 to vector<4x128xf32>
    %c0_26 = arith.constant 0 : index
    %c0_27 = arith.constant 0 : index
    %29 = vector.load %arg8[%c0_26, %c0_27] : memref<20x128xf32, #tpu.memory_space<vmem>>, vector<4x128xf32>
    tpu.vector_store %arg8[%c0_26, %c0_27], %28 {strides = array<i32>} : memref<20x128xf32, #tpu.memory_space<vmem>>, vector<4x128xf32>,
    %c4_28 = arith.constant 4 : index
    %c0_29 = arith.constant 0 : index
    %30 = vector.load %arg8[%c4_28, %c0_29] : memref<20x128xf32, #tpu.memory_space<vmem>>, vector<16x128xf32>
    tpu.vector_store %arg8[%c4_28, %c0_29], %27 {strides = array<i32>} : memref<20x128xf32, #tpu.memory_space<vmem>>, vector<16x128xf32>,
    %cst_30 = arith.constant 0.000000e+00 : f32
    %31 = vector.broadcast %cst_30 : f32 to vector<16x128xf32>
    %c0_31 = arith.constant 0 : index
    %c0_32 = arith.constant 0 : index
    %32 = vector.load %arg8[%c0_31, %c0_32] : memref<20x128xf32, #tpu.memory_space<vmem>>, vector<16x128xf32>
    %c0_33 = arith.constant 0 : index
    %c0_34 = arith.constant 0 : index
    %c0_35 = arith.constant 0 : index
    %33 = vector.load %arg4[%c0_33, %c0_34, %c0_35] : memref<3x128x128xf32, #tpu.memory_space<vmem>>, vector<1x128x128xf32>
    %34 = vector.shape_cast %33 : vector<1x128x128xf32> to vector<128x128xf32>
    %cst_36 = arith.constant dense<0.000000e+00> : vector<16x128xf32>
    %35 = tpu.matmul %32, %34, %cst_36 {dimension_numbers = #tpu.dot_dimension_numbers<[1], [0], [0], [1], [0, 0, 1, 1], [], []>} : vector<16x128xf32>, vector<128x128xf32>, vector<16x128xf32> -> vector<16x128xf32>
    %36 = arith.addf %31, %35 : vector<16x128xf32>
    %c2_37 = arith.constant 2 : index
    %c0_38 = arith.constant 0 : index
    %37 = vector.load %arg8[%c2_37, %c0_38] : memref<20x128xf32, #tpu.memory_space<vmem>>, vector<16x128xf32>
    %c1_39 = arith.constant 1 : index
    %c0_40 = arith.constant 0 : index
    %c0_41 = arith.constant 0 : index
    %38 = vector.load %arg4[%c1_39, %c0_40, %c0_41] : memref<3x128x128xf32, #tpu.memory_space<vmem>>, vector<1x128x128xf32>
    %39 = vector.shape_cast %38 : vector<1x128x128xf32> to vector<128x128xf32>
    %cst_42 = arith.constant dense<0.000000e+00> : vector<16x128xf32>
    %40 = tpu.matmul %37, %39, %cst_42 {dimension_numbers = #tpu.dot_dimension_numbers<[1], [0], [0], [1], [0, 0, 1, 1], [], []>} : vector<16x128xf32>, vector<128x128xf32>, vector<16x128xf32> -> vector<16x128xf32>
    %41 = arith.addf %36, %40 : vector<16x128xf32>
    %c4_43 = arith.constant 4 : index
    %c0_44 = arith.constant 0 : index
    %42 = vector.load %arg8[%c4_43, %c0_44] : memref<20x128xf32, #tpu.memory_space<vmem>>, vector<16x128xf32>
    %c2_45 = arith.constant 2 : index
    %c0_46 = arith.constant 0 : index
    %c0_47 = arith.constant 0 : index
    %43 = vector.load %arg4[%c2_45, %c0_46, %c0_47] : memref<3x128x128xf32, #tpu.memory_space<vmem>>, vector<1x128x128xf32>
    %44 = vector.shape_cast %43 : vector<1x128x128xf32> to vector<128x128xf32>
    %cst_48 = arith.constant dense<0.000000e+00> : vector<16x128xf32>
    %45 = tpu.matmul %42, %44, %cst_48 {dimension_numbers = #tpu.dot_dimension_numbers<[1], [0], [0], [1], [0, 0, 1, 1], [], []>} : vector<16x128xf32>, vector<128x128xf32>, vector<16x128xf32> -> vector<16x128xf32>
    %46 = arith.addf %41, %45 : vector<16x128xf32>
    %c0_49 = arith.constant 0 : index
    %c0_50 = arith.constant 0 : index
    %47 = vector.load %arg5[%c0_49, %c0_50] : memref<1x128xf32, #tpu.memory_space<vmem>>, vector<1x128xf32>
    %48 = vector.shape_cast %47 : vector<1x128xf32> to vector<128xf32>
    %49 = vector.shape_cast %48 : vector<128xf32> to vector<1x128xf32>
    %50 = vector.broadcast %49 : vector<1x128xf32> to vector<16x128xf32>
    %51 = arith.addf %46, %50 : vector<16x128xf32>
    %cst_51 = arith.constant 0.000000e+00 : f32
    %52 = vector.broadcast %cst_51 : f32 to vector<16x128xf32>
    %53 = arith.maximumf %51, %52 : vector<16x128xf32>
    %54 = arith.addf %53, %1 : vector<16x128xf32>
    %cst_52 = arith.constant 0.000000e+00 : f32
    %55 = vector.broadcast %cst_52 : f32 to vector<16x128xf32>
    %56 = arith.maximumf %54, %55 : vector<16x128xf32>
    %c0_53 = arith.constant 0 : index
    %c0_54 = arith.constant 0 : index
    %c0_55 = arith.constant 0 : index
    %57 = vector.load %arg6[%c0_53, %c0_54, %c0_55] : memref<1x16x128xf32, #tpu.memory_space<vmem>>, vector<1x16x128xf32>
    %58 = vector.shape_cast %57 : vector<1x16x128xf32> to vector<16x128xf32>
    %59 = vector.shape_cast %56 : vector<16x128xf32> to vector<1x16x128xf32>
    tpu.vector_store %arg6[%c0_53, %c0_54, %c0_55], %59 {strides = array<i32>} : memref<1x16x128xf32, #tpu.memory_space<vmem>>, vector<1x16x128xf32>,
    return
  }
  func.func @transform_0(%arg0: i32) -> (i32, i32, i32) {
    %c0_i32 = arith.constant 0 : i32
    %c0_i32_0 = arith.constant 0 : i32
    %c0_i32_1 = arith.constant 0 : i32
    return %arg0, %c0_i32, %c0_i32_0 : i32, i32, i32
  }
  func.func @transform_1(%arg0: i32) -> (i32, i32, i32) {
    %c0_i32 = arith.constant 0 : i32
    %c0_i32_0 = arith.constant 0 : i32
    %c0_i32_1 = arith.constant 0 : i32
    %c0_i32_2 = arith.constant 0 : i32
    return %c0_i32, %c0_i32_0, %c0_i32_1 : i32, i32, i32
  }
  func.func @transform_2(%arg0: i32) -> (i32, i32) {
    %c0_i32 = arith.constant 0 : i32
    %c0_i32_0 = arith.constant 0 : i32
    %c0_i32_1 = arith.constant 0 : i32
    return %c0_i32, %c0_i32_0 : i32, i32
  }
  func.func @transform_3(%arg0: i32) -> (i32, i32, i32) {
    %c0_i32 = arith.constant 0 : i32
    %c0_i32_0 = arith.constant 0 : i32
    %c0_i32_1 = arith.constant 0 : i32
    %c0_i32_2 = arith.constant 0 : i32
    return %c0_i32, %c0_i32_0, %c0_i32_1 : i32, i32, i32
  }
  func.func @transform_4(%arg0: i32) -> (i32, i32) {
    %c0_i32 = arith.constant 0 : i32
    %c0_i32_0 = arith.constant 0 : i32
    %c0_i32_1 = arith.constant 0 : i32
    return %c0_i32, %c0_i32_0 : i32, i32
  }
  func.func @transform_5(%arg0: i32) -> (i32, i32, i32) {
    %c0_i32 = arith.constant 0 : i32
    %c0_i32_0 = arith.constant 0 : i32
    %c0_i32_1 = arith.constant 0 : i32
    return %arg0, %c0_i32, %c0_i32_0 : i32, i32, i32
  }
}

module attributes {stable_mosaic.version = 11 : i64} {
  func.func @_temporal_block_kernel(%arg0: i32, %arg1: memref<1x16x128xf32, #tpu.memory_space<vmem>>, %arg2: memref<3x128x128xf32, #tpu.memory_space<vmem>>, %arg3: memref<1x128xf32, #tpu.memory_space<vmem>>, %arg4: memref<3x128x128xf32, #tpu.memory_space<vmem>>, %arg5: memref<1x128xf32, #tpu.memory_space<vmem>>, %arg6: memref<1x128x128xf32, #tpu.memory_space<vmem>>, %arg7: memref<1x128xf32, #tpu.memory_space<vmem>>, %arg8: memref<1x16x128xf32, #tpu.memory_space<vmem>>, %arg9: memref<18x128xf32, #tpu.memory_space<vmem>>, %arg10: memref<18x128xf32, #tpu.memory_space<vmem>>) attributes {dimension_semantics = [#tpu.dimension_semantics<parallel>], iteration_bounds = array<i64: 2>, scalar_prefetch = 0 : i64, scratch_operands = 2 : i64, tpu.core_type = #tpu.core_type<tc>, window_params = [{transform_indices = @transform_0, window_bounds = array<i64: 1, 16, 128>}, {pipeline_mode = #tpu.pipeline_mode<synchronous>, transform_indices = @transform_1, window_bounds = array<i64: 3, 128, 128>}, {pipeline_mode = #tpu.pipeline_mode<synchronous>, transform_indices = @transform_2, window_bounds = array<i64: 1, 128>}, {pipeline_mode = #tpu.pipeline_mode<synchronous>, transform_indices = @transform_3, window_bounds = array<i64: 3, 128, 128>}, {pipeline_mode = #tpu.pipeline_mode<synchronous>, transform_indices = @transform_4, window_bounds = array<i64: 1, 128>}, {pipeline_mode = #tpu.pipeline_mode<synchronous>, transform_indices = @transform_5, window_bounds = array<i64: 1, 128, 128>}, {pipeline_mode = #tpu.pipeline_mode<synchronous>, transform_indices = @transform_6, window_bounds = array<i64: 1, 128>}, {transform_indices = @transform_7, window_bounds = array<i64: 1, 16, 128>}]} {
    %c0 = arith.constant 0 : index
    %c0_0 = arith.constant 0 : index
    %c0_1 = arith.constant 0 : index
    %0 = vector.load %arg1[%c0, %c0_0, %c0_1] : memref<1x16x128xf32, #tpu.memory_space<vmem>>, vector<1x16x128xf32>
    %1 = vector.shape_cast %0 : vector<1x16x128xf32> to vector<16x128xf32>
    %cst = arith.constant 0.000000e+00 : f32
    %2 = vector.broadcast %cst : f32 to vector<2x128xf32>
    %c0_2 = arith.constant 0 : index
    %c0_3 = arith.constant 0 : index
    %3 = vector.load %arg9[%c0_2, %c0_3] : memref<18x128xf32, #tpu.memory_space<vmem>>, vector<2x128xf32>
    tpu.vector_store %arg9[%c0_2, %c0_3], %2 {strides = array<i32>} : memref<18x128xf32, #tpu.memory_space<vmem>>, vector<2x128xf32>,
    %c2 = arith.constant 2 : index
    %c0_4 = arith.constant 0 : index
    %4 = vector.load %arg9[%c2, %c0_4] : memref<18x128xf32, #tpu.memory_space<vmem>>, vector<16x128xf32>
    tpu.vector_store %arg9[%c2, %c0_4], %1 {strides = array<i32>} : memref<18x128xf32, #tpu.memory_space<vmem>>, vector<16x128xf32>,
    %cst_5 = arith.constant 0.000000e+00 : f32
    %5 = vector.broadcast %cst_5 : f32 to vector<16x128xf32>
    %c0_6 = arith.constant 0 : index
    %c0_7 = arith.constant 0 : index
    %6 = vector.load %arg9[%c0_6, %c0_7] : memref<18x128xf32, #tpu.memory_space<vmem>>, vector<16x128xf32>
    %c0_8 = arith.constant 0 : index
    %c0_9 = arith.constant 0 : index
    %c0_10 = arith.constant 0 : index
    %7 = vector.load %arg2[%c0_8, %c0_9, %c0_10] : memref<3x128x128xf32, #tpu.memory_space<vmem>>, vector<1x128x128xf32>
    %8 = vector.shape_cast %7 : vector<1x128x128xf32> to vector<128x128xf32>
    %cst_11 = arith.constant dense<0.000000e+00> : vector<16x128xf32>
    %9 = tpu.matmul %6, %8, %cst_11 {dimension_numbers = #tpu.dot_dimension_numbers<[1], [0], [0], [1], [0, 0, 1, 1], [], []>} : vector<16x128xf32>, vector<128x128xf32>, vector<16x128xf32> -> vector<16x128xf32>
    %10 = arith.addf %5, %9 : vector<16x128xf32>
    %c1 = arith.constant 1 : index
    %c0_12 = arith.constant 0 : index
    %11 = vector.load %arg9[%c1, %c0_12] : memref<18x128xf32, #tpu.memory_space<vmem>>, vector<16x128xf32>
    %c1_13 = arith.constant 1 : index
    %c0_14 = arith.constant 0 : index
    %c0_15 = arith.constant 0 : index
    %12 = vector.load %arg2[%c1_13, %c0_14, %c0_15] : memref<3x128x128xf32, #tpu.memory_space<vmem>>, vector<1x128x128xf32>
    %13 = vector.shape_cast %12 : vector<1x128x128xf32> to vector<128x128xf32>
    %cst_16 = arith.constant dense<0.000000e+00> : vector<16x128xf32>
    %14 = tpu.matmul %11, %13, %cst_16 {dimension_numbers = #tpu.dot_dimension_numbers<[1], [0], [0], [1], [0, 0, 1, 1], [], []>} : vector<16x128xf32>, vector<128x128xf32>, vector<16x128xf32> -> vector<16x128xf32>
    %15 = arith.addf %10, %14 : vector<16x128xf32>
    %c2_17 = arith.constant 2 : index
    %c0_18 = arith.constant 0 : index
    %16 = vector.load %arg9[%c2_17, %c0_18] : memref<18x128xf32, #tpu.memory_space<vmem>>, vector<16x128xf32>
    %c2_19 = arith.constant 2 : index
    %c0_20 = arith.constant 0 : index
    %c0_21 = arith.constant 0 : index
    %17 = vector.load %arg2[%c2_19, %c0_20, %c0_21] : memref<3x128x128xf32, #tpu.memory_space<vmem>>, vector<1x128x128xf32>
    %18 = vector.shape_cast %17 : vector<1x128x128xf32> to vector<128x128xf32>
    %cst_22 = arith.constant dense<0.000000e+00> : vector<16x128xf32>
    %19 = tpu.matmul %16, %18, %cst_22 {dimension_numbers = #tpu.dot_dimension_numbers<[1], [0], [0], [1], [0, 0, 1, 1], [], []>} : vector<16x128xf32>, vector<128x128xf32>, vector<16x128xf32> -> vector<16x128xf32>
    %20 = arith.addf %15, %19 : vector<16x128xf32>
    %c0_23 = arith.constant 0 : index
    %c0_24 = arith.constant 0 : index
    %21 = vector.load %arg3[%c0_23, %c0_24] : memref<1x128xf32, #tpu.memory_space<vmem>>, vector<1x128xf32>
    %22 = vector.shape_cast %21 : vector<1x128xf32> to vector<128xf32>
    %23 = vector.shape_cast %22 : vector<128xf32> to vector<1x128xf32>
    %24 = vector.broadcast %23 : vector<1x128xf32> to vector<16x128xf32>
    %25 = arith.addf %20, %24 : vector<16x128xf32>
    %cst_25 = arith.constant 0.000000e+00 : f32
    %26 = vector.broadcast %cst_25 : f32 to vector<16x128xf32>
    %27 = arith.maximumf %25, %26 : vector<16x128xf32>
    %cst_26 = arith.constant 0.000000e+00 : f32
    %28 = vector.broadcast %cst_26 : f32 to vector<2x128xf32>
    %c0_27 = arith.constant 0 : index
    %c0_28 = arith.constant 0 : index
    %29 = vector.load %arg10[%c0_27, %c0_28] : memref<18x128xf32, #tpu.memory_space<vmem>>, vector<2x128xf32>
    tpu.vector_store %arg10[%c0_27, %c0_28], %28 {strides = array<i32>} : memref<18x128xf32, #tpu.memory_space<vmem>>, vector<2x128xf32>,
    %c2_29 = arith.constant 2 : index
    %c0_30 = arith.constant 0 : index
    %30 = vector.load %arg10[%c2_29, %c0_30] : memref<18x128xf32, #tpu.memory_space<vmem>>, vector<16x128xf32>
    tpu.vector_store %arg10[%c2_29, %c0_30], %27 {strides = array<i32>} : memref<18x128xf32, #tpu.memory_space<vmem>>, vector<16x128xf32>,
    %cst_31 = arith.constant 0.000000e+00 : f32
    %31 = vector.broadcast %cst_31 : f32 to vector<16x128xf32>
    %c0_32 = arith.constant 0 : index
    %c0_33 = arith.constant 0 : index
    %32 = vector.load %arg10[%c0_32, %c0_33] : memref<18x128xf32, #tpu.memory_space<vmem>>, vector<16x128xf32>
    %c0_34 = arith.constant 0 : index
    %c0_35 = arith.constant 0 : index
    %c0_36 = arith.constant 0 : index
    %33 = vector.load %arg4[%c0_34, %c0_35, %c0_36] : memref<3x128x128xf32, #tpu.memory_space<vmem>>, vector<1x128x128xf32>
    %34 = vector.shape_cast %33 : vector<1x128x128xf32> to vector<128x128xf32>
    %cst_37 = arith.constant dense<0.000000e+00> : vector<16x128xf32>
    %35 = tpu.matmul %32, %34, %cst_37 {dimension_numbers = #tpu.dot_dimension_numbers<[1], [0], [0], [1], [0, 0, 1, 1], [], []>} : vector<16x128xf32>, vector<128x128xf32>, vector<16x128xf32> -> vector<16x128xf32>
    %36 = arith.addf %31, %35 : vector<16x128xf32>
    %c1_38 = arith.constant 1 : index
    %c0_39 = arith.constant 0 : index
    %37 = vector.load %arg10[%c1_38, %c0_39] : memref<18x128xf32, #tpu.memory_space<vmem>>, vector<16x128xf32>
    %c1_40 = arith.constant 1 : index
    %c0_41 = arith.constant 0 : index
    %c0_42 = arith.constant 0 : index
    %38 = vector.load %arg4[%c1_40, %c0_41, %c0_42] : memref<3x128x128xf32, #tpu.memory_space<vmem>>, vector<1x128x128xf32>
    %39 = vector.shape_cast %38 : vector<1x128x128xf32> to vector<128x128xf32>
    %cst_43 = arith.constant dense<0.000000e+00> : vector<16x128xf32>
    %40 = tpu.matmul %37, %39, %cst_43 {dimension_numbers = #tpu.dot_dimension_numbers<[1], [0], [0], [1], [0, 0, 1, 1], [], []>} : vector<16x128xf32>, vector<128x128xf32>, vector<16x128xf32> -> vector<16x128xf32>
    %41 = arith.addf %36, %40 : vector<16x128xf32>
    %c2_44 = arith.constant 2 : index
    %c0_45 = arith.constant 0 : index
    %42 = vector.load %arg10[%c2_44, %c0_45] : memref<18x128xf32, #tpu.memory_space<vmem>>, vector<16x128xf32>
    %c2_46 = arith.constant 2 : index
    %c0_47 = arith.constant 0 : index
    %c0_48 = arith.constant 0 : index
    %43 = vector.load %arg4[%c2_46, %c0_47, %c0_48] : memref<3x128x128xf32, #tpu.memory_space<vmem>>, vector<1x128x128xf32>
    %44 = vector.shape_cast %43 : vector<1x128x128xf32> to vector<128x128xf32>
    %cst_49 = arith.constant dense<0.000000e+00> : vector<16x128xf32>
    %45 = tpu.matmul %42, %44, %cst_49 {dimension_numbers = #tpu.dot_dimension_numbers<[1], [0], [0], [1], [0, 0, 1, 1], [], []>} : vector<16x128xf32>, vector<128x128xf32>, vector<16x128xf32> -> vector<16x128xf32>
    %46 = arith.addf %41, %45 : vector<16x128xf32>
    %c0_50 = arith.constant 0 : index
    %c0_51 = arith.constant 0 : index
    %47 = vector.load %arg5[%c0_50, %c0_51] : memref<1x128xf32, #tpu.memory_space<vmem>>, vector<1x128xf32>
    %48 = vector.shape_cast %47 : vector<1x128xf32> to vector<128xf32>
    %49 = vector.shape_cast %48 : vector<128xf32> to vector<1x128xf32>
    %50 = vector.broadcast %49 : vector<1x128xf32> to vector<16x128xf32>
    %51 = arith.addf %46, %50 : vector<16x128xf32>
    %cst_52 = arith.constant 0.000000e+00 : f32
    %52 = vector.broadcast %cst_52 : f32 to vector<16x128xf32>
    %53 = arith.maximumf %51, %52 : vector<16x128xf32>
    %c0_53 = arith.constant 0 : index
    %c0_54 = arith.constant 0 : index
    %c0_55 = arith.constant 0 : index
    %54 = vector.load %arg6[%c0_53, %c0_54, %c0_55] : memref<1x128x128xf32, #tpu.memory_space<vmem>>, vector<1x128x128xf32>
    %55 = vector.shape_cast %54 : vector<1x128x128xf32> to vector<128x128xf32>
    %cst_56 = arith.constant dense<0.000000e+00> : vector<16x128xf32>
    %56 = tpu.matmul %1, %55, %cst_56 {dimension_numbers = #tpu.dot_dimension_numbers<[1], [0], [0], [1], [0, 0, 1, 1], [], []>} : vector<16x128xf32>, vector<128x128xf32>, vector<16x128xf32> -> vector<16x128xf32>
    %c0_57 = arith.constant 0 : index
    %c0_58 = arith.constant 0 : index
    %57 = vector.load %arg7[%c0_57, %c0_58] : memref<1x128xf32, #tpu.memory_space<vmem>>, vector<1x128xf32>
    %58 = vector.shape_cast %57 : vector<1x128xf32> to vector<128xf32>
    %59 = vector.shape_cast %58 : vector<128xf32> to vector<1x128xf32>
    %60 = vector.broadcast %59 : vector<1x128xf32> to vector<16x128xf32>
    %61 = arith.addf %56, %60 : vector<16x128xf32>
    %62 = arith.addf %53, %61 : vector<16x128xf32>
    %cst_59 = arith.constant 0.000000e+00 : f32
    %63 = vector.broadcast %cst_59 : f32 to vector<16x128xf32>
    %64 = arith.maximumf %62, %63 : vector<16x128xf32>
    %c0_60 = arith.constant 0 : index
    %c0_61 = arith.constant 0 : index
    %c0_62 = arith.constant 0 : index
    %65 = vector.load %arg8[%c0_60, %c0_61, %c0_62] : memref<1x16x128xf32, #tpu.memory_space<vmem>>, vector<1x16x128xf32>
    %66 = vector.shape_cast %65 : vector<1x16x128xf32> to vector<16x128xf32>
    %67 = vector.shape_cast %64 : vector<16x128xf32> to vector<1x16x128xf32>
    tpu.vector_store %arg8[%c0_60, %c0_61, %c0_62], %67 {strides = array<i32>} : memref<1x16x128xf32, #tpu.memory_space<vmem>>, vector<1x16x128xf32>,
    return
  }
  func.func @transform_0(%arg0: i32) -> (i32, i32, i32) {
    %c0_i32 = arith.constant 0 : i32
    %c0_i32_0 = arith.constant 0 : i32
    %c0_i32_1 = arith.constant 0 : i32
    return %arg0, %c0_i32, %c0_i32_0 : i32, i32, i32
  }
  func.func @transform_1(%arg0: i32) -> (i32, i32, i32) {
    %c0_i32 = arith.constant 0 : i32
    %c0_i32_0 = arith.constant 0 : i32
    %c0_i32_1 = arith.constant 0 : i32
    %c0_i32_2 = arith.constant 0 : i32
    return %c0_i32, %c0_i32_0, %c0_i32_1 : i32, i32, i32
  }
  func.func @transform_2(%arg0: i32) -> (i32, i32) {
    %c0_i32 = arith.constant 0 : i32
    %c0_i32_0 = arith.constant 0 : i32
    %c0_i32_1 = arith.constant 0 : i32
    return %c0_i32, %c0_i32_0 : i32, i32
  }
  func.func @transform_3(%arg0: i32) -> (i32, i32, i32) {
    %c0_i32 = arith.constant 0 : i32
    %c0_i32_0 = arith.constant 0 : i32
    %c0_i32_1 = arith.constant 0 : i32
    %c0_i32_2 = arith.constant 0 : i32
    return %c0_i32, %c0_i32_0, %c0_i32_1 : i32, i32, i32
  }
  func.func @transform_4(%arg0: i32) -> (i32, i32) {
    %c0_i32 = arith.constant 0 : i32
    %c0_i32_0 = arith.constant 0 : i32
    %c0_i32_1 = arith.constant 0 : i32
    return %c0_i32, %c0_i32_0 : i32, i32
  }
  func.func @transform_5(%arg0: i32) -> (i32, i32, i32) {
    %c0_i32 = arith.constant 0 : i32
    %c0_i32_0 = arith.constant 0 : i32
    %c0_i32_1 = arith.constant 0 : i32
    %c0_i32_2 = arith.constant 0 : i32
    return %c0_i32, %c0_i32_0, %c0_i32_1 : i32, i32, i32
  }
  func.func @transform_6(%arg0: i32) -> (i32, i32) {
    %c0_i32 = arith.constant 0 : i32
    %c0_i32_0 = arith.constant 0 : i32
    %c0_i32_1 = arith.constant 0 : i32
    return %c0_i32, %c0_i32_0 : i32, i32
  }
  func.func @transform_7(%arg0: i32) -> (i32, i32, i32) {
    %c0_i32 = arith.constant 0 : i32
    %c0_i32_0 = arith.constant 0 : i32
    %c0_i32_1 = arith.constant 0 : i32
    return %arg0, %c0_i32, %c0_i32_0 : i32, i32, i32
  }
}

</mosaic_0001>

<bundles_post_ra>
// kernel: tcn_pre_forward.3
= control target key start
LH: loop header
LB: loop body
LE: loop exit
PB: predicated region body
PF: predicated region fallthrough
CT: control target
= control target key end

     0   :  { %s1527_s18 = smov 0   ;;  %s1862_s0 = inlined_call_operand.vmem [shape: f32[2,16,128], index: 0, kind: input, shape index: {}]   ;;  %s1863_s1 = inlined_call_operand.vmem [shape: f32[3,128,128], index: 1, kind: input, shape index: {}]   ;;  %s1864_s2 = inlined_call_operand.vmem [shape: f32[1,128], index: 2, kind: input, shape index: {}]   ;;  %s1865_s3 = inlined_call_operand.vmem [shape: f32[3,128,128], index: 3, kind: input, shape index: {}]   ;;  %s1866_s4 = inlined_call_operand.vmem [shape: f32[1,128], index: 4, kind: input, shape index: {}]   ;;  %s1867_s5 = inlined_call_operand.vmem [shape: f32[2,16,128], index: 5, kind: output, shape index: {}]  }
   0x1 LB: > { %s882_s19 = sadd.s32 4294967295, %s1494_s18   ;;  %p886_p0 = scmp.ge.s32.totalorder %s1494_s18, 1  ;;  %s1494_s18 = sphi %s1527_s18, %s15_s18  }
   0x2   : > { %p187_p1 = scmp.lt.s32.totalorder %s1494_s18, 3 }
   0x4   : > { %p188_p2 = pnand %p886_p0, %p187_p1 }
   0x5   : > { %v891_v0 = vld [vmem:[%s1863_s1 + $0x80] sm:$0xff] (!%p188_p2)  ;;  %v892_v1 = vld [vmem:[%s1863_s1 + $0x88] sm:$0xff] (!%p188_p2)  ;;  %v893_v2 = vld [vmem:[%s1863_s1 + $0x90] sm:$0xff] (!%p188_p2)  ;;  %p215_p3 = scmp.lt.s32.totalorder (!%p188_p2), %s882_s19, 1  ;;  %v1496_v5 = vmov (!%p188_p2), 0.0  }
   0x6   : > { %191 = sbr.rel (%p188_p2) target bundleno = 616 (0x268), region = 40  ;;  %v1279_v3 = vpack.c.bf16 (!%p188_p2), %v892_v1, %v891_v0  ;;  %v894_v4 = vld [vmem:[%s1863_s1 + $0x98] sm:$0xff] (!%p188_p2)  ;;  %227 = vst [vmem:[#allocation2] sm:$0xf] (!%p188_p2), %v1496_v5  ;;  %524 = vst [vmem:[#allocation3] sm:$0xf] (!%p188_p2), %v1496_v5 }
   0x7   : > { %v1283_v6 = vpack.c.bf16 (!%p188_p2), %v894_v4, %v893_v2  ;;  %v895_v7 = vld [vmem:[%s1863_s1 + $0xa0] sm:$0xff] (!%p188_p2)  ;;  %v896_v8 = vld [vmem:[%s1863_s1 + $0xa8] sm:$0xff] (!%p188_p2)  ;;  %v897_v10 = vld [vmem:[%s1863_s1 + $0xb0] sm:$0xff] (!%p188_p2) }
   0x8   : > { %1280 = vmatprep.subr.bf16.mxu0 (!%p188_p2), %v1279_v3  ;;  %v1287_v9 = vpack.c.bf16 (!%p188_p2), %v896_v8, %v895_v7  ;;  %v898_v11 = vld [vmem:[%s1863_s1 + $0xb8] sm:$0xff] (!%p188_p2)  ;;  %v899_v15 = vld [vmem:[%s1863_s1 + $0xc0] sm:$0xff] (!%p188_p2)  ;;  %v900_v16 = vld [vmem:[%s1863_s1 + $0xc8] sm:$0xff] (!%p188_p2) }
   0x9   : > { %1282 = vmatpush3.bf16.msra.mxu0 (!%p188_p2), %v1279_v3  ;;  %v1291_v14 = vpack.c.bf16 (!%p188_p2), %v898_v11, %v897_v10  ;;  %v1295_v17 = vpack.c.bf16 (!%p188_p2), %v900_v16, %v899_v15  ;;  %v901_v18 = vld [vmem:[%s1863_s1 + $0xd0] sm:$0xff] (!%p188_p2)  ;;  %v902_v19 = vld [vmem:[%s1863_s1 + $0xd8] sm:$0xff] (!%p188_p2)  ;;  %v903_v22 = vld [vmem:[%s1863_s1 + $0xe0] sm:$0xff] (!%p188_p2) }
   0xa   : > { %1284 = vmatprep.subr.bf16.mxu0 (!%p188_p2), %v1283_v6  ;;  %v1299_v21 = vpack.c.bf16 (!%p188_p2), %v902_v19, %v901_v18  ;;  %v904_v23 = vld [vmem:[%s1863_s1 + $0xe8] sm:$0xff] (!%p188_p2)  ;;  %v924_v24 = vld [vmem:[%s1865_s3 + $0x80] sm:$0xff] (!%p188_p2)  ;;  %v926_v26 = vld [vmem:[%s1865_s3 + $0x90] sm:$0xff] (!%p188_p2) }
   0xb   : > { %v925_v25 = vld [vmem:[%s1865_s3 + $0x88] sm:$0xff] (!%p188_p2)  ;;  %v927_v28 = vld [vmem:[%s1865_s3 + $0x98] sm:$0xff] (!%p188_p2)  ;;  %v928_v30 = vld [vmem:[%s1865_s3 + $0xa0] sm:$0xff] (!%p188_p2)  ;;  %v1303_v32 = vpack.c.bf16 (!%p188_p2), %v904_v23, %v903_v22 }
   0xc   : > { %v1375_v27 = vpack.c.bf16 (!%p188_p2), %v925_v25, %v924_v24  ;;  %v1379_v29 = vpack.c.bf16 (!%p188_p2), %v927_v28, %v926_v26  ;;  %v929_v31 = vld [vmem:[%s1865_s3 + $0xa8] sm:$0xff] (!%p188_p2)  ;;  %v905_v33 = vld [vmem:[%s1863_s1 + $0xf0] sm:$0xff] (!%p188_p2)  ;;  %v906_v34 = vld [vmem:[%s1863_s1 + $0xf8] sm:$0xff] (!%p188_p2) }
   0xd   : > { %s1869_s19 = smov (!%p215_p3, %s882_s19), 1  ;;  %1286 = vmatpush3.bf16.msra.mxu0 %v1283_v6  ;;  %v1383_v35 = vpack.c.bf16 %v929_v31, %v928_v30  ;;  %v930_v36 = vld [vmem:[%s1865_s3 + $0xb0] sm:$0xff]  ;;  %v931_v37 = vld [vmem:[%s1865_s3 + $0xb8] sm:$0xff]  ;;  %v1307_v38 = vpack.c.bf16 %v906_v34, %v905_v33  ;;  %v232_v39 = vld [vmem:[%s1863_s1] sm:$0xff] }
   0xe   : > { %s959_s7 = sshll.u32 %s1869_s19, 4  ;;  %1288 = vmatprep.subr.bf16.mxu0 %v1287_v9  ;;  %1376 = vmatprep.subr.bf16.mxu1 %v1375_v27  ;;  %v233_v40 = vld [vmem:[%s1863_s1 + $0x8] sm:$0xff]  ;;  %v1387_v41 = vpack.c.bf16 %v931_v37, %v930_v36  ;;  %v932_v42 = vld [vmem:[%s1865_s3 + $0xc0] sm:$0xff]  ;;  %v234_v45 = vld [vmem:[%s1863_s1 + $0x10] sm:$0xff] }
   0xf   : > { %s219_s12 = scalar_lea.vmem %s1862_s0, %s959_s7  ;;  %1378 = vmatpush3.bf16.msra.mxu1 %v1375_v27  ;;  %v933_v43 = vld [vmem:[%s1865_s3 + $0xc8] sm:$0xff]  ;;  %v1311_v44 = vpack.c.bf16 %v233_v40, %v232_v39  ;;  %v235_v46 = vld [vmem:[%s1863_s1 + $0x18] sm:$0xff]  ;;  %v236_v51 = vld [vmem:[%s1863_s1 + $0x20] sm:$0xff]  ;;  %s224_s23 = scalar_lea.vmem %s1867_s5, %s959_s7 }
  0x10   : > { %v1567_v12 = vld [vmem:[%s219_s12] sm:$0xff]  ;;  %v1569_v13 = vld [vmem:[%s219_s12 + $0x8] sm:$0xff]  ;;  %1380 = vmatprep.subr.bf16.mxu1 %v1379_v29  ;;  %v1391_v47 = vpack.c.bf16 %v933_v43, %v932_v42  ;;  %v1315_v49 = vpack.c.bf16 %v235_v46, %v234_v45  ;;  %v238_v54 = vld [vmem:[%s1863_s1 + $0x30] sm:$0xff] }
  0x11   : > { %228 = vst [vmem:[#allocation2 + $0x4] sm:$0xff] %v1567_v12  ;;  %229 = vst [vmem:[#allocation2 + $0xc] sm:$0xff] %v1569_v13  ;;  %1290 = vmatpush3.bf16.msra.mxu0 %v1287_v9  ;;  %v237_v52 = vld [vmem:[%s1863_s1 + $0x28] sm:$0xff]  ;;  %v239_v55 = vld [vmem:[%s1863_s1 + $0x38] sm:$0xff] }
  0x12   : > { %1292 = vmatprep.subr.bf16.mxu0 %v1291_v14  ;;  %v1319_v53 = vpack.c.bf16 %v237_v52, %v236_v51  ;;  %v1323_v56 = vpack.c.bf16 %v239_v55, %v238_v54  ;;  %v240_v57 = vld [vmem:[%s1863_s1 + $0x40] sm:$0xff]  ;;  %v241_v58 = vld [vmem:[%s1863_s1 + $0x48] sm:$0xff]  ;;  %v242_v60 = vld [vmem:[%s1863_s1 + $0x50] sm:$0xff] }
  0x13   : > { %1382 = vmatpush3.bf16.msra.mxu1 %v1379_v29  ;;  %v1327_v59 = vpack.c.bf16 %v241_v58, %v240_v57  ;;  %v243_v61 = vld [vmem:[%s1863_s1 + $0x58] sm:$0xff]  ;;  %v244_v63 = vld [vmem:[%s1863_s1 + $0x60] sm:$0xff]  ;;  %v245_v0 = vld [vmem:[%s1863_s1 + $0x68] sm:$0xff] }
  0x14   : > { %1384 = vmatprep.subr.bf16.mxu1 %v1383_v35  ;;  %v1331_v62 = vpack.c.bf16 %v243_v61, %v242_v60  ;;  %v1335_v1 = vpack.c.bf16 %v245_v0, %v244_v63  ;;  %v246_v2 = vld [vmem:[%s1863_s1 + $0x70] sm:$0xff]  ;;  %v247_v3 = vld [vmem:[%s1863_s1 + $0x78] sm:$0xff]  ;;  %v907_v5 = vld [vmem:[%s1863_s1 + $0x100] sm:$0xff] }
  0x15   : > { %1294 = vmatpush3.bf16.msra.mxu0 %v1291_v14  ;;  %v1339_v4 = vpack.c.bf16 %v247_v3, %v246_v2  ;;  %v908_v6 = vld [vmem:[%s1863_s1 + $0x108] sm:$0xff]  ;;  %v909_v8 = vld [vmem:[%s1863_s1 + $0x110] sm:$0xff]  ;;  %v910_v9 = vld [vmem:[%s1863_s1 + $0x118] sm:$0xff] }
  0x16   : > { %1296 = vmatprep.subr.bf16.mxu0 %v1295_v17  ;;  %v1343_v7 = vpack.c.bf16 %v908_v6, %v907_v5  ;;  %v1347_v11 = vpack.c.bf16 %v910_v9, %v909_v8  ;;  %v911_v14 = vld [vmem:[%s1863_s1 + $0x120] sm:$0xff]  ;;  %v912_v15 = vld [vmem:[%s1863_s1 + $0x128] sm:$0xff]  ;;  %v914_v18 = vld [vmem:[%s1863_s1 + $0x138] sm:$0xff] }
  0x17   : > { %1386 = vmatpush3.bf16.msra.mxu1 %v1383_v35  ;;  %v1351_v16 = vpack.c.bf16 %v912_v15, %v911_v14  ;;  %v917_v23 = vld [vmem:[%s1863_s1 + $0x150] sm:$0xff]  ;;  %v918_v24 = vld [vmem:[%s1863_s1 + $0x158] sm:$0xff]  ;;  %v919_v26 = vld [vmem:[%s1863_s1 + $0x160] sm:$0xff] }
  0x18   : > { %v248_v20 = vld [vmem:[#allocation2 + $0x2] sm:$0xff]  ;;  %1388 = vmatprep.subr.bf16.mxu1 %v1387_v41  ;;  %v249_v48 = vld [vmem:[#allocation2 + $0xa] sm:$0xff]  ;;  %v1363_v25 = vpack.c.bf16 %v918_v24, %v917_v23  ;;  %v922_v30 = vld [vmem:[%s1863_s1 + $0x178] sm:$0xff] }
  0x19   : > { %1101 = vmatprep.mubr.f32.mxu0 %v248_v20  ;;  %1298 = vmatpush3.bf16.msra.mxu0 %v1295_v17  ;;  %v230_v50 = vld [vmem:[#allocation2] sm:$0xff]  ;;  %v231_v10 = vld [vmem:[#allocation2 + $0x8] sm:$0xff]  ;;  %v913_v17 = vld [vmem:[%s1863_s1 + $0x130] sm:$0xff] }
  0x1a   : > { %1300 = vmatprep.subr.bf16.mxu0 %v1299_v21  ;;  %v1355_v19 = vpack.c.bf16 %v914_v18, %v913_v17  ;;  %v915_v20 = vld [vmem:[%s1863_s1 + $0x140] sm:$0xff]  ;;  %v920_v27 = vld [vmem:[%s1863_s1 + $0x168] sm:$0xff]  ;;  %v921_v29 = vld [vmem:[%s1863_s1 + $0x170] sm:$0xff] }
  0x1b   : > { %1390 = vmatpush3.bf16.msra.mxu1 %v1387_v41  ;;  %v1367_v28 = vpack.c.bf16 %v920_v27, %v919_v26  ;;  %v1371_v31 = vpack.c.bf16 %v922_v30, %v921_v29  ;;  %v935_v33 = vld [vmem:[%s1865_s3 + $0xd8] sm:$0xff]  ;;  %v936_v35 = vld [vmem:[%s1865_s3 + $0xe0] sm:$0xff]  ;;  %v937_v36 = vld [vmem:[%s1865_s3 + $0xe8] sm:$0xff] }
  0x1c   : > { %1392 = vmatprep.subr.bf16.mxu1 %v1391_v47  ;;  %v1399_v37 = vpack.c.bf16 %v937_v36, %v936_v35  ;;  %v939_v39 = vld [vmem:[%s1865_s3 + $0xf8] sm:$0xff]  ;;  %v529_v41 = vld [vmem:[%s1865_s3] sm:$0xff]  ;;  %v530_v42 = vld [vmem:[%s1865_s3 + $0x8] sm:$0xff] }
  0x1d   : > { %1302 = vmatpush3.bf16.msra.mxu0 %v1299_v21  ;;  %v916_v21 = vld [vmem:[%s1863_s1 + $0x148] sm:$0xff]  ;;  %v1407_v43 = vpack.c.bf16 %v530_v42, %v529_v41  ;;  %v531_v51 = vld [vmem:[%s1865_s3 + $0x10] sm:$0xff]  ;;  %v532_v52 = vld [vmem:[%s1865_s3 + $0x18] sm:$0xff] }
  0x1e   : > { %1304 = vmatprep.subr.bf16.mxu0 %v1303_v32  ;;  %v1359_v22 = vpack.c.bf16 %v916_v21, %v915_v20  ;;  %v1411_v55 = vpack.c.bf16 %v532_v52, %v531_v51  ;;  %v534_v57 = vld [vmem:[%s1865_s3 + $0x28] sm:$0xff]  ;;  %v535_v60 = vld [vmem:[%s1865_s3 + $0x30] sm:$0xff]  ;;  %v536_v61 = vld [vmem:[%s1865_s3 + $0x38] sm:$0xff] }
  0x1f   : > { %1394 = vmatpush3.bf16.msra.mxu1 %v1391_v47  ;;  %v537_v63 = vld [vmem:[%s1865_s3 + $0x40] sm:$0xff]  ;;  %v538_v0 = vld [vmem:[%s1865_s3 + $0x48] sm:$0xff]  ;;  %v539_v2 = vld [vmem:[%s1865_s3 + $0x50] sm:$0xff] }
  0x20   : > { %v540_v3 = vld [vmem:[%s1865_s3 + $0x58] sm:$0xff]  ;;  %v541_v5 = vld [vmem:[%s1865_s3 + $0x60] sm:$0xff]  ;;  %v542_v6 = vld [vmem:[%s1865_s3 + $0x68] sm:$0xff] }
  0x21   : > { %1306 = vmatpush3.bf16.msra.mxu0 %v1303_v32  ;;  %v934_v32 = vld [vmem:[%s1865_s3 + $0xd0] sm:$0xff]  ;;  %v544_v9 = vld [vmem:[%s1865_s3 + $0x78] sm:$0xff]  ;;  %v941_v14 = vld [vmem:[%s1865_s3 + $0x108] sm:$0xff] }
  0x22   : > { %1308 = vmatprep.subr.bf16.mxu0 %v1307_v38  ;;  %v1395_v34 = vpack.c.bf16 %v935_v33, %v934_v32  ;;  %v543_v8 = vld [vmem:[%s1865_s3 + $0x70] sm:$0xff]  ;;  %v943_v17 = vld [vmem:[%s1865_s3 + $0x118] sm:$0xff]  ;;  %v944_v20 = vld [vmem:[%s1865_s3 + $0x120] sm:$0xff] }
  0x23   : > { %v945_v21 = vld [vmem:[%s1865_s3 + $0x128] sm:$0xff]  ;;  %v946_v23 = vld [vmem:[%s1865_s3 + $0x130] sm:$0xff]  ;;  %v947_v24 = vld [vmem:[%s1865_s3 + $0x138] sm:$0xff] }
  0x24   : > { %1396 = vmatprep.subr.bf16.mxu1 %v1395_v34  ;;  %v948_v26 = vld [vmem:[%s1865_s3 + $0x140] sm:$0xff]  ;;  %v949_v27 = vld [vmem:[%s1865_s3 + $0x148] sm:$0xff]  ;;  %v950_v29 = vld [vmem:[%s1865_s3 + $0x150] sm:$0xff] }
  0x25   : > { %1310 = vmatpush3.bf16.msra.mxu0 %v1307_v38  ;;  %1398 = vmatpush3.bf16.msra.mxu1 %v1395_v34  ;;  %v938_v38 = vld [vmem:[%s1865_s3 + $0xf0] sm:$0xff]  ;;  %v951_v30 = vld [vmem:[%s1865_s3 + $0x158] sm:$0xff]  ;;  %v952_v32 = vld [vmem:[%s1865_s3 + $0x160] sm:$0xff] }
  0x26   : > { %1312 = vmatprep.subr.bf16.mxu0 %v1311_v44  ;;  %1400 = vmatprep.subr.bf16.mxu1 %v1399_v37  ;;  %v1403_v40 = vpack.c.bf16 %v939_v39, %v938_v38  ;;  %v953_v33 = vld [vmem:[%s1865_s3 + $0x168] sm:$0xff]  ;;  %v954_v35 = vld [vmem:[%s1865_s3 + $0x170] sm:$0xff]  ;;  %v955_v36 = vld [vmem:[%s1865_s3 + $0x178] sm:$0xff] }
  0x27   : > { %v1463_v34 = vpack.c.bf16 %v953_v33, %v952_v32  ;;  %v956_v38 = vld [vmem:[%s1866_s4] ss:$0 sm:$0xff] }
  0x28   : > { %1102 = vmatmul.mubr.f32.vlgmr.msra.gmra.mrb[0].mxu0 %v249_v48 }
  0x29   : > { %1314 = vmatpush3.bf16.msra.mxu0 %v1311_v44  ;;  %1136 = vmatprep.mubr.f32.mxu0 %v230_v50  ;;  %v923_v44 = vld [vmem:[%s1864_s2] ss:$0 sm:$0xff] }
  0x2a   : > { %1316 = vmatprep.subr.bf16.mxu0 %v1315_v49  ;;  %1402 = vmatpush3.bf16.msra.mxu1 %v1399_v37  ;;  %v1467_v37 = vpack.c.bf16 %v955_v36, %v954_v35 }
  0x2b   : > { %1404 = vmatprep.subr.bf16.mxu1 %v1403_v40 }
  0x2d   : > { %1318 = vmatpush3.bf16.msra.mxu0 %v1315_v49 }
  0x2e   : > { %1320 = vmatprep.subr.bf16.mxu0 %v1319_v53  ;;  %1406 = vmatpush3.bf16.msra.mxu1 %v1403_v40 }
  0x2f   : > { %1408 = vmatprep.subr.bf16.mxu1 %v1407_v43 }
  0x31   : > { %1322 = vmatpush3.bf16.msra.mxu0 %v1319_v53 }
  0x32   : > { %1324 = vmatprep.subr.bf16.mxu0 %v1323_v56 }
  0x35   : > { %1326 = vmatpush3.bf16.msra.mxu0 %v1323_v56  ;;  %v533_v56 = vld [vmem:[%s1865_s3 + $0x20] sm:$0xff] }
  0x36   : > { %1328 = vmatprep.subr.bf16.mxu0 %v1327_v59 }
  0x39   : > { %1330 = vmatpush3.bf16.msra.mxu0 %v1327_v59  ;;  %v1415_v59 = vpack.c.bf16 %v534_v57, %v533_v56 }
  0x3a   : > { %1332 = vmatprep.subr.bf16.mxu0 %v1331_v62 }
  0x3d   : > { %1334 = vmatpush3.bf16.msra.mxu0 %v1331_v62  ;;  %v1419_v62 = vpack.c.bf16 %v536_v61, %v535_v60 }
  0x3e   : > { %1336 = vmatprep.subr.bf16.mxu0 %v1335_v1 }
  0x41   : > { %1338 = vmatpush3.bf16.msra.mxu0 %v1335_v1  ;;  %v1423_v1 = vpack.c.bf16 %v538_v0, %v537_v63 }
  0x42   : > { %1340 = vmatprep.subr.bf16.mxu0 %v1339_v4 }
  0x45   : > { %1342 = vmatpush3.bf16.msra.mxu0 %v1339_v4  ;;  %v1427_v4 = vpack.c.bf16 %v540_v3, %v539_v2 }
  0x46   : > { %1344 = vmatprep.subr.bf16.mxu0 %v1343_v7 }
  0x48   : > { %1137 = vmatmul.mubr.f32.vlgmr.msra.gmra.mrb[0].mxu0 %v231_v10  ;;  %v1435_v10 = vpack.c.bf16 %v544_v9, %v543_v8 }
  0x49   : > { %1346 = vmatpush3.bf16.msra.mxu0 %v1343_v7  ;;  %1171 = vmatprep.mubr.f32.mxu0 %v1567_v12  ;;  %v1431_v7 = vpack.c.bf16 %v542_v6, %v541_v5 }
  0x4a   : > { %1348 = vmatprep.subr.bf16.mxu0 %v1347_v11 }
  0x4d   : > { %1350 = vmatpush3.bf16.msra.mxu0 %v1347_v11  ;;  %v940_v11 = vld [vmem:[%s1865_s3 + $0x100] sm:$0xff] }
  0x4e   : > { %1352 = vmatprep.subr.bf16.mxu0 %v1351_v16  ;;  %v1439_v15 = vpack.c.bf16 %v941_v14, %v940_v11 }
  0x51   : > { %1354 = vmatpush3.bf16.msra.mxu0 %v1351_v16  ;;  %v942_v16 = vld [vmem:[%s1865_s3 + $0x110] sm:$0xff] }
  0x52   : > { %1356 = vmatprep.subr.bf16.mxu0 %v1355_v19  ;;  %v1443_v18 = vpack.c.bf16 %v943_v17, %v942_v16 }
  0x55   : > { %1358 = vmatpush3.bf16.msra.mxu0 %v1355_v19 }
  0x56   : > { %1360 = vmatprep.subr.bf16.mxu0 %v1359_v22 }
  0x59   : > { %1362 = vmatpush3.bf16.msra.mxu0 %v1359_v22  ;;  %v1447_v22 = vpack.c.bf16 %v945_v21, %v944_v20 }
  0x5a   : > { %1364 = vmatprep.subr.bf16.mxu0 %v1363_v25 }
  0x5d   : > { %1366 = vmatpush3.bf16.msra.mxu0 %v1363_v25  ;;  %v1451_v25 = vpack.c.bf16 %v947_v24, %v946_v23 }
  0x5e   : > { %1368 = vmatprep.subr.bf16.mxu0 %v1367_v28 }
  0x61   : > { %1370 = vmatpush3.bf16.msra.mxu0 %v1367_v28  ;;  %v1455_v28 = vpack.c.bf16 %v949_v27, %v948_v26 }
  0x62   : > { %1372 = vmatprep.subr.bf16.mxu0 %v1371_v31 }
  0x65   : > { %1374 = vmatpush3.bf16.msra.mxu0 %v1371_v31  ;;  %v1459_v31 = vpack.c.bf16 %v951_v30, %v950_v29 }
  0x68   : > { %1172 = vmatmul.mubr.f32.vlgmr.msra.gmra.mrb[0].mxu0 %v1569_v13 }
 0x13b   : > { %v1173_v45 = vpop.f32.mrb[0].mxu0 }
 0x13c   : > { %v1752_v46 = vadd.f32 %v1173_v45, %v923_v44  ;;  %v502_v47 = vpop.f32.mrb[1].mxu0 }
 0x13d   : > { %v520_v48 = vadd.f32 %v923_v44, %v502_v47 }
 0x13e   : > { %v523_v49 = vmax.f32 %v1752_v46, 0.0 }
 0x13f   : > { %v522_v50 = vmax.f32 %v520_v48, 0.0 }
 0x140   : > { %526 = vst [vmem:[#allocation3 + $0xc] sm:$0xff] %v523_v49 }
 0x141   : > { %525 = vst [vmem:[#allocation3 + $0x4] sm:$0xff] %v522_v50 }
 0x148   : > { %v545_v53 = vld [vmem:[#allocation3 + $0x2] sm:$0xff]  ;;  %v546_v54 = vld [vmem:[#allocation3 + $0xa] sm:$0xff] }
 0x149   : > { %1206 = vmatprep.mubr.f32.mxu1 %v545_v53  ;;  %v527_v58 = vld [vmem:[#allocation3] sm:$0xff]  ;;  %v528_v19 = vld [vmem:[#allocation3 + $0x8] sm:$0xff] }
 0x14a   : > { %1207 = vmatmul.mubr.f32.vlgmr.msra.gmra.mrb[0].mxu1 %v546_v54 }
 0x14b   : > { %1410 = vmatpush3.bf16.msra.mxu1 %v1407_v43  ;;  %1241 = vmatprep.mubr.f32.mxu1 %v527_v58 }
 0x14c   : > { %1412 = vmatprep.subr.bf16.mxu1 %v1411_v55 }
 0x14f   : > { %1414 = vmatpush3.bf16.msra.mxu1 %v1411_v55 }
 0x150   : > { %1416 = vmatprep.subr.bf16.mxu1 %v1415_v59 }
 0x153   : > { %1418 = vmatpush3.bf16.msra.mxu1 %v1415_v59 }
 0x154   : > { %1420 = vmatprep.subr.bf16.mxu1 %v1419_v62 }
 0x157   : > { %1422 = vmatpush3.bf16.msra.mxu1 %v1419_v62 }
 0x158   : > { %1424 = vmatprep.subr.bf16.mxu1 %v1423_v1 }
 0x15b   : > { %1426 = vmatpush3.bf16.msra.mxu1 %v1423_v1 }
 0x15c   : > { %1428 = vmatprep.subr.bf16.mxu1 %v1427_v4 }
 0x15f   : > { %1430 = vmatpush3.bf16.msra.mxu1 %v1427_v4 }
 0x160   : > { %1432 = vmatprep.subr.bf16.mxu1 %v1431_v7 }
 0x163   : > { %1434 = vmatpush3.bf16.msra.mxu1 %v1431_v7 }
 0x164   : > { %1436 = vmatprep.subr.bf16.mxu1 %v1435_v10 }
 0x167   : > { %1438 = vmatpush3.bf16.msra.mxu1 %v1435_v10 }
 0x168   : > { %1440 = vmatprep.subr.bf16.mxu1 %v1439_v15 }
 0x16a   : > { %1242 = vmatmul.mubr.f32.vlgmr.msra.gmra.mrb[0].mxu1 %v528_v19 }
 0x16b   : > { %1442 = vmatpush3.bf16.msra.mxu1 %v1439_v15  ;;  %1276 = vmatprep.mubr.f32.mxu1 %v522_v50 }
 0x16c   : > { %1444 = vmatprep.subr.bf16.mxu1 %v1443_v18 }
 0x16f   : > { %1446 = vmatpush3.bf16.msra.mxu1 %v1443_v18 }
 0x170   : > { %1448 = vmatprep.subr.bf16.mxu1 %v1447_v22 }
 0x173   : > { %1450 = vmatpush3.bf16.msra.mxu1 %v1447_v22 }
 0x174   : > { %1452 = vmatprep.subr.bf16.mxu1 %v1451_v25 }
 0x177   : > { %1454 = vmatpush3.bf16.msra.mxu1 %v1451_v25 }
 0x178   : > { %1456 = vmatprep.subr.bf16.mxu1 %v1455_v28 }
 0x17b   : > { %1458 = vmatpush3.bf16.msra.mxu1 %v1455_v28 }
 0x17c   : > { %1460 = vmatprep.subr.bf16.mxu1 %v1459_v31 }
 0x17f   : > { %1462 = vmatpush3.bf16.msra.mxu1 %v1459_v31 }
 0x180   : > { %1464 = vmatprep.subr.bf16.mxu1 %v1463_v34 }
 0x183   : > { %1466 = vmatpush3.bf16.msra.mxu1 %v1463_v34 }
 0x184   : > { %1468 = vmatprep.subr.bf16.mxu1 %v1467_v37 }
 0x187   : > { %1470 = vmatpush3.bf16.msra.mxu1 %v1467_v37 }
 0x18a   : > { %1277 = vmatmul.mubr.f32.vlgmr.msra.gmra.mrb[0].mxu1 %v523_v49 }
 0x25d   : > { %v1278_v39 = vpop.f32.mrb[0].mxu1 }
 0x25e   : > { %v818_v40 = vadd.f32 %v1278_v39, %v956_v38  ;;  %v799_v41 = vpop.f32.mrb[1].mxu1 }
 0x25f   : > { %v817_v42 = vadd.f32 %v956_v38, %v799_v41 }
 0x260   : > { %v820_v43 = vmax.f32 %v818_v40, 0.0 }
 0x261   : > { %v819_v44 = vmax.f32 %v817_v42, 0.0 }
 0x262   : > { %v822_v45 = vadd.f32 %v820_v43, %v1569_v13 }
 0x263   : > { %v821_v46 = vadd.f32 %v819_v44, %v1567_v12 }
 0x264   : > { %v824_v47 = vmax.f32 %v822_v45, 0.0 }
 0x265   : > { %v823_v48 = vmax.f32 %v821_v46, 0.0 }
 0x266   : > { %826 = vst [vmem:[%s224_s23 + $0x8] sm:$0xff] %v824_v47 }
 0x267   : > { %825 = vst [vmem:[%s224_s23] sm:$0xff] %v823_v48 }
 0x268 PF: > { %s15_s18 = sadd.s32 1, %s1494_s18  }
 0x269   : > { %p12_p4 = scmp.ge.s32.totalorder %s15_s18, 4  }
 0x26b   :  { %14 = sbr.rel (!%p12_p4) target bundleno = 1 (0x1), region = 74 }

// kernel: tcn_pre_forward.2
= control target key start
LH: loop header
LB: loop body
LE: loop exit
PB: predicated region body
PF: predicated region fallthrough
CT: control target
= control target key end

     0   :  { %12 = vsyncpa [#allocation5], 0  ;;  %s2082_s0 = inlined_call_operand.vmem [shape: f32[2,16,128], index: 0, kind: input, shape index: {}]   ;;  %s2083_s1 = inlined_call_operand.hbm [shape: f32[3,128,128], index: 1, kind: input, shape index: {}]   ;;  %s2084_s2 = inlined_call_operand.vmem [shape: f32[1,128], index: 2, kind: input, shape index: {}]   ;;  %s2085_s3 = inlined_call_operand.hbm [shape: f32[3,128,128], index: 3, kind: input, shape index: {}]   ;;  %s2086_s4 = inlined_call_operand.vmem [shape: f32[1,128], index: 4, kind: input, shape index: {}]   ;;  %s2087_s5 = inlined_call_operand.hbm [shape: f32[1,128,128], index: 5, kind: input, shape index: {}]   ;;  %s2088_s6 = inlined_call_operand.vmem [shape: f32[1,128], index: 6, kind: input, shape index: {}]   ;;  %s2089_s7 = inlined_call_operand.vmem [shape: f32[2,16,128], index: 7, kind: output, shape index: {}]  }
   0x1   :  { %13 = vsyncpa [#allocation7], 0  ;;  %s1922_s24 = smov 0  }
   0x2 LB: > { %s1928_s25 = sadd.s32 4294967295, %s1874_s24   ;;  %p1111_p0 = scmp.ge.s32.totalorder %s1874_s24, 1  ;;  %s1874_s24 = sphi %s1922_s24, %s19_s24  }
   0x3   : > { %p202_p1 = scmp.lt.s32.totalorder %s1874_s24, 3  ;;  %p2090_p2 = scmp.eq.s32.totalorder %s1928_s25, 0 }
   0x4   : > { %s1876_s27 = smov [#allocation6]   ;;  %s1877_s29 = smov [#allocation4]  }
   0x5   : > { %p1933_p3 = pnand %p1111_p0, %p202_p1  ;;  %s230_s28 = sshll.u32 %s1876_s27, 4  ;;  %s231_s28 = int_to_ptr.vmem [resolvable:$true] %s230_s28 }
   0x6   : > { %s214_s30 = sshll.u32 %s1877_s29, 4  ;;  %s1878_s9 = smov [#allocation8]   ;;  %s1945_s30 = int_to_ptr.vmem [resolvable:$true] %s214_s30 }
   0x7   : > { %s2092_s26 = scalar_select %p1933_p3, 1, 0 }
   0x8   : > { %p1746_p4 = pneg %p1933_p3  ;;  %s246_s10 = sshll.u32 %s1878_s9, 4  ;;  %s1947_s10 = int_to_ptr.vmem [resolvable:$true] %s246_s10 }
   0x9   : > { %s1776_s13 = scalar_lea.hbm %s2085_s3, 6144 }
   0xa   : > { %p1941_p5 = pnand %p2090_p2, %p1746_p4  ;;  %p1777_p6 = scmp.ne.s32.totalorder %s2085_s3, %s1776_s13 }
   0xb   : > { %p1783_p10 = scmp.lt.u32.totalorder %s1776_s13, %s2085_s3 }
   0xc   : > { %p1957_p7 = pneg %p1941_p5 }
   0xe   : > { %p1779_p8 = pnand %p1957_p7, %p1777_p6 }
  0x10   : > { %p1780_p9 = pneg %p1779_p8 }
  0x12   : > { %p1785_p11 = pnand %p1783_p10, %p1780_p9 }
  0x14   : > { %1788 = shalt.err (!%p1785_p11)
}
  0x15   : > { %s1789_s19 = scalar_lea.vmem %s231_s28, 6144  ;;  %p1797_p1 = scmp.lt.s32.totalorder %s231_s28, %s231_s28 }
  0x16   : > { %p1790_p12 = scmp.ne.s32.totalorder %s231_s28, %s1789_s19  ;;  %p1798_p4 = scmp.lt.s32.totalorder %s1789_s19, %s1789_s19 }
  0x18   : > { %p1792_p13 = pnand %p1790_p12, %p1957_p7  ;;  %p1799_p2 = por %p1798_p4, %p1797_p1 }
  0x1a   : > { %p1793_p0 = pneg %p1792_p13 }
  0x1c   : > { %p1800_p3 = pnand %p1799_p2, %p1793_p0 }
  0x1e   : > { %1803 = shalt.err (!%p1800_p3)
}
  0x1f   : > { %s1879_s20 = smov 128   ;;  %s1880_s21 = smov 8  }
  0x20   : > { %1752 = dma.hbm_to_vmem [thread:$0]  (!%p1941_p5), %s2085_s3, 6144, %s231_s28, [#allocation7], %s1879_s20, %s1879_s20, %s1880_s21  }
  0x21   : > { %s1804_s9 = scalar_lea.hbm %s2083_s1, 6144 }
  0x22   : > { %p1805_p2 = scmp.ne.s32.totalorder %s2083_s1, %s1804_s9  ;;  %p1811_p8 = scmp.lt.u32.totalorder %s1804_s9, %s2083_s1 }
  0x24   : > { %p1807_p3 = pnand %p1805_p2, %p1957_p7 }
  0x26   : > { %p1808_p6 = pneg %p1807_p3 }
  0x28   : > { %p1813_p9 = pnand %p1811_p8, %p1808_p6 }
  0x2a   : > { %1816 = shalt.err (!%p1813_p9)
}
  0x2b   : > { %s1817_s28 = scalar_lea.vmem %s1945_s30, 6144  ;;  %p1825_p13 = scmp.lt.s32.totalorder %s1945_s30, %s1945_s30 }
  0x2c   : > { %p1818_p10 = scmp.ne.s32.totalorder %s1945_s30, %s1817_s28  ;;  %p1826_p0 = scmp.lt.s32.totalorder %s1817_s28, %s1817_s28 }
  0x2e   : > { %p1820_p11 = pnand %p1818_p10, %p1957_p7  ;;  %p1827_p1 = por %p1826_p0, %p1825_p13 }
  0x30   : > { %p1821_p12 = pneg %p1820_p11 }
  0x32   : > { %p1828_p4 = pnand %p1827_p1, %p1821_p12 }
  0x34   : > { %1831 = shalt.err (!%p1828_p4)
}
  0x35   : > { %1749 = dma.hbm_to_vmem [thread:$0]  (!%p1941_p5), %s2083_s1, 6144, %s1945_s30, [#allocation5], %s1879_s20, %s1879_s20, %s1880_s21  }
  0x36   : > { %s1832_s22 = scalar_lea.hbm %s2087_s5, 2048 }
  0x37   : > { %p1833_p2 = scmp.ne.s32.totalorder %s2087_s5, %s1832_s22  ;;  %p1839_p8 = scmp.lt.u32.totalorder %s1832_s22, %s2087_s5 }
  0x39   : > { %p1835_p3 = pnand %p1833_p2, %p1957_p7 }
  0x3b   : > { %p1836_p6 = pneg %p1835_p3 }
  0x3d   : > { %p1841_p9 = pnand %p1839_p8, %p1836_p6 }
  0x3f   : > { %1844 = shalt.err (!%p1841_p9)
}
  0x40   : > { %s1845_s30 = scalar_lea.vmem %s1947_s10, 2048  ;;  %p1853_p13 = scmp.lt.s32.totalorder %s1947_s10, %s1947_s10 }
  0x41   : > { %p1846_p10 = scmp.ne.s32.totalorder %s1947_s10, %s1845_s30  ;;  %p1854_p0 = scmp.lt.s32.totalorder %s1845_s30, %s1845_s30 }
  0x43   : > { %p1848_p11 = pnand %p1846_p10, %p1957_p7  ;;  %p1855_p1 = por %p1854_p0, %p1853_p13 }
  0x45   : > { %p1849_p12 = pneg %p1848_p11 }
  0x47   : > { %p1856_p4 = pnand %p1855_p1, %p1849_p12 }
  0x49   : > { %1859 = shalt.err (!%p1856_p4)
}
  0x4a   : > { %1755 = dma.hbm_to_vmem [thread:$0]  (!%p1941_p5), %s2087_s5, 2048, %s1947_s10, [#allocation7], %s1879_s20, %s1879_s20, %s1880_s21  }
  0x4b   : > { %p2095_p2 = scmp.ne.s32.totalorder %s2092_s26, 0 }
  0x4c   : > { %p2096_p7 = scmp.eq.s32.totalorder (!%p2095_p2), %s1928_s25, 0 }
  0x4d   : > { %273 = sbr.rel (%p2095_p2) target bundleno = 700 (0x2bc), region = 48 }
  0x54   : > { %1865 = dma.done.wait (%p2096_p7), [#allocation5], 6144   ;;  %p2097_p3 = pmov %p2096_p7 }
  0x56   : > { %1867 = vsyncadd (%p2097_p3), [#allocation5], 4294961152  ;;  %p2098_p6 = pmov %p2097_p3 }
  0x57   : > { %p2099_p8 = pmov %p2097_p3 }
  0x58   : > { %1869 = dma.done.wait (%p2098_p6), [#allocation7], 8192  }
  0x59   : > { %1871 = vsyncadd (%p2099_p8), [#allocation7], 4294959104  ;;  %p313_p9 = scmp.lt.s32.totalorder %s1928_s25, 1  ;;  %v1881_v0 = vmov 0.0   ;;  %v349_v1 = vld [vmem:[#allocation4 + $0x80] sm:$0xff]  ;;  %v350_v2 = vld [vmem:[#allocation4 + $0x88] sm:$0xff] }
  0x5a   : > { %325 = vst [vmem:[#allocation2] sm:$0x3] %v1881_v0  ;;  %622 = vst [vmem:[#allocation3] sm:$0x3] %v1881_v0  ;;  %v351_v3 = vld [vmem:[#allocation4 + $0x90] sm:$0xff]  ;;  %v1502_v4 = vpack.c.bf16 %v350_v2, %v349_v1  ;;  %v352_v5 = vld [vmem:[#allocation4 + $0x98] sm:$0xff] }
  0x5b   : > { %s2101_s25 = smov (!%p313_p9, %s1928_s25), 1  ;;  %v1506_v6 = vpack.c.bf16 %v352_v5, %v351_v3  ;;  %v353_v7 = vld [vmem:[#allocation4 + $0xa0] sm:$0xff]  ;;  %v354_v8 = vld [vmem:[#allocation4 + $0xa8] sm:$0xff]  ;;  %v355_v11 = vld [vmem:[#allocation4 + $0xb0] sm:$0xff] }
  0x5c   : > { %s1129_s26 = sshll.u32 %s2101_s25, 4  ;;  %1503 = vmatprep.subr.bf16.mxu0 %v1502_v4  ;;  %v1510_v9 = vpack.c.bf16 %v354_v8, %v353_v7  ;;  %v356_v12 = vld [vmem:[#allocation4 + $0xb8] sm:$0xff]  ;;  %v357_v15 = vld [vmem:[#allocation4 + $0xc0] sm:$0xff]  ;;  %v358_v16 = vld [vmem:[#allocation4 + $0xc8] sm:$0xff] }
  0x5d   : > { %s317_s16 = scalar_lea.vmem %s2082_s0, %s1129_s26  ;;  %1505 = vmatpush3.bf16.msra.mxu0 %v1502_v4  ;;  %v1514_v14 = vpack.c.bf16 %v356_v12, %v355_v11  ;;  %v1518_v17 = vpack.c.bf16 %v358_v16, %v357_v15  ;;  %v359_v19 = vld [vmem:[#allocation4 + $0xd0] sm:$0xff]  ;;  %v360_v20 = vld [vmem:[#allocation4 + $0xd8] sm:$0xff]  ;;  %v361_v22 = vld [vmem:[#allocation4 + $0xe0] sm:$0xff]  ;;  %s322_s19 = scalar_lea.vmem %s2089_s7, %s1129_s26 }
  0x5e   : > { %1507 = vmatprep.subr.bf16.mxu0 %v1506_v6  ;;  %v2048_v10 = vld [vmem:[%s317_s16] sm:$0xff]  ;;  %v2051_v13 = vld [vmem:[%s317_s16 + $0x8] sm:$0xff]  ;;  %v1522_v21 = vpack.c.bf16 %v360_v20, %v359_v19  ;;  %v362_v23 = vld [vmem:[#allocation4 + $0xe8] sm:$0xff] }
  0x5f   : > { %326 = vst [vmem:[#allocation2 + $0x2] sm:$0xff] %v2048_v10  ;;  %327 = vst [vmem:[#allocation2 + $0xa] sm:$0xff] %v2051_v13  ;;  %v646_v24 = vld [vmem:[#allocation6 + $0x80] sm:$0xff]  ;;  %v647_v25 = vld [vmem:[#allocation6 + $0x88] sm:$0xff]  ;;  %v1526_v32 = vpack.c.bf16 %v362_v23, %v361_v22 }
  0x60   : > { %v648_v26 = vld [vmem:[#allocation6 + $0x90] sm:$0xff]  ;;  %v1598_v27 = vpack.c.bf16 %v647_v25, %v646_v24  ;;  %v649_v28 = vld [vmem:[#allocation6 + $0x98] sm:$0xff]  ;;  %v650_v30 = vld [vmem:[#allocation6 + $0xa0] sm:$0xff] }
  0x61   : > { %1509 = vmatpush3.bf16.msra.mxu0 %v1506_v6  ;;  %v1602_v29 = vpack.c.bf16 %v649_v28, %v648_v26  ;;  %v651_v31 = vld [vmem:[#allocation6 + $0xa8] sm:$0xff]  ;;  %v363_v33 = vld [vmem:[#allocation4 + $0xf0] sm:$0xff]  ;;  %v364_v34 = vld [vmem:[#allocation4 + $0xf8] sm:$0xff] }
  0x62   : > { %1511 = vmatprep.subr.bf16.mxu0 %v1510_v9  ;;  %1599 = vmatprep.subr.bf16.mxu1 %v1598_v27  ;;  %v1606_v35 = vpack.c.bf16 %v651_v31, %v650_v30  ;;  %v652_v36 = vld [vmem:[#allocation6 + $0xb0] sm:$0xff]  ;;  %v653_v37 = vld [vmem:[#allocation6 + $0xb8] sm:$0xff]  ;;  %v1530_v38 = vpack.c.bf16 %v364_v34, %v363_v33  ;;  %v330_v39 = vld [vmem:[#allocation4] sm:$0xff] }
  0x63   : > { %1601 = vmatpush3.bf16.msra.mxu1 %v1598_v27  ;;  %v331_v40 = vld [vmem:[#allocation4 + $0x8] sm:$0xff]  ;;  %v1610_v41 = vpack.c.bf16 %v653_v37, %v652_v36  ;;  %v654_v42 = vld [vmem:[#allocation6 + $0xc0] sm:$0xff]  ;;  %v332_v45 = vld [vmem:[#allocation4 + $0x10] sm:$0xff] }
  0x64   : > { %1603 = vmatprep.subr.bf16.mxu1 %v1602_v29  ;;  %v655_v43 = vld [vmem:[#allocation6 + $0xc8] sm:$0xff]  ;;  %v1534_v44 = vpack.c.bf16 %v331_v40, %v330_v39  ;;  %v333_v46 = vld [vmem:[#allocation4 + $0x18] sm:$0xff]  ;;  %v334_v51 = vld [vmem:[#allocation4 + $0x20] sm:$0xff] }
  0x65   : > { %1513 = vmatpush3.bf16.msra.mxu0 %v1510_v9  ;;  %v1614_v47 = vpack.c.bf16 %v655_v43, %v654_v42  ;;  %v1538_v49 = vpack.c.bf16 %v333_v46, %v332_v45  ;;  %v335_v52 = vld [vmem:[#allocation4 + $0x28] sm:$0xff]  ;;  %v336_v54 = vld [vmem:[#allocation4 + $0x30] sm:$0xff]  ;;  %v337_v55 = vld [vmem:[#allocation4 + $0x38] sm:$0xff] }
  0x66   : > { %1515 = vmatprep.subr.bf16.mxu0 %v1514_v14  ;;  %v346_v18 = vld [vmem:[#allocation2 + $0x1] sm:$0xff]  ;;  %v347_v48 = vld [vmem:[#allocation2 + $0x9] sm:$0xff]  ;;  %v1542_v53 = vpack.c.bf16 %v335_v52, %v334_v51  ;;  %v1546_v56 = vpack.c.bf16 %v337_v55, %v336_v54  ;;  %v339_v58 = vld [vmem:[#allocation4 + $0x48] sm:$0xff] }
  0x67   : > { %1289 = vmatprep.mubr.f32.mxu0 %v346_v18  ;;  %1605 = vmatpush3.bf16.msra.mxu1 %v1602_v29  ;;  %v328_v50 = vld [vmem:[#allocation2] sm:$0xff]  ;;  %v338_v57 = vld [vmem:[#allocation4 + $0x40] sm:$0xff]  ;;  %v341_v61 = vld [vmem:[#allocation4 + $0x58] sm:$0xff] }
  0x68   : > { %1607 = vmatprep.subr.bf16.mxu1 %v1606_v35  ;;  %v1550_v59 = vpack.c.bf16 %v339_v58, %v338_v57  ;;  %v340_v60 = vld [vmem:[#allocation4 + $0x50] sm:$0xff]  ;;  %v342_v63 = vld [vmem:[#allocation4 + $0x60] sm:$0xff]  ;;  %v343_v0 = vld [vmem:[#allocation4 + $0x68] sm:$0xff] }
  0x69   : > { %1517 = vmatpush3.bf16.msra.mxu0 %v1514_v14  ;;  %v1554_v62 = vpack.c.bf16 %v341_v61, %v340_v60  ;;  %v1558_v1 = vpack.c.bf16 %v343_v0, %v342_v63  ;;  %v344_v2 = vld [vmem:[#allocation4 + $0x70] sm:$0xff]  ;;  %v345_v3 = vld [vmem:[#allocation4 + $0x78] sm:$0xff]  ;;  %v518_v5 = vld [vmem:[#allocation4 + $0x100] sm:$0xff] }
  0x6a   : > { %1519 = vmatprep.subr.bf16.mxu0 %v1518_v17  ;;  %v1562_v4 = vpack.c.bf16 %v345_v3, %v344_v2  ;;  %v519_v6 = vld [vmem:[#allocation4 + $0x108] sm:$0xff]  ;;  %v520_v8 = vld [vmem:[#allocation4 + $0x110] sm:$0xff]  ;;  %v521_v9 = vld [vmem:[#allocation4 + $0x118] sm:$0xff] }
  0x6b   : > { %1609 = vmatpush3.bf16.msra.mxu1 %v1606_v35  ;;  %v1566_v7 = vpack.c.bf16 %v519_v6, %v518_v5  ;;  %v329_v11 = vld [vmem:[#allocation2 + $0x8] sm:$0xff]  ;;  %v1570_v12 = vpack.c.bf16 %v521_v9, %v520_v8  ;;  %v522_v14 = vld [vmem:[#allocation4 + $0x120] sm:$0xff]  ;;  %v523_v15 = vld [vmem:[#allocation4 + $0x128] sm:$0xff] }
  0x6c   : > { %1611 = vmatprep.subr.bf16.mxu1 %v1610_v41  ;;  %v1574_v16 = vpack.c.bf16 %v523_v15, %v522_v14  ;;  %v525_v18 = vld [vmem:[#allocation4 + $0x138] sm:$0xff]  ;;  %v526_v20 = vld [vmem:[#allocation4 + $0x140] sm:$0xff]  ;;  %v528_v23 = vld [vmem:[#allocation4 + $0x150] sm:$0xff] }
  0x6d   : > { %1521 = vmatpush3.bf16.msra.mxu0 %v1518_v17  ;;  %v524_v17 = vld [vmem:[#allocation4 + $0x130] sm:$0xff]  ;;  %v529_v24 = vld [vmem:[#allocation4 + $0x158] sm:$0xff]  ;;  %v530_v26 = vld [vmem:[#allocation4 + $0x160] sm:$0xff] }
  0x6e   : > { %1523 = vmatprep.subr.bf16.mxu0 %v1522_v21  ;;  %v1578_v19 = vpack.c.bf16 %v525_v18, %v524_v17  ;;  %v1586_v25 = vpack.c.bf16 %v529_v24, %v528_v23  ;;  %v531_v27 = vld [vmem:[#allocation4 + $0x168] sm:$0xff]  ;;  %v532_v29 = vld [vmem:[#allocation4 + $0x170] sm:$0xff]  ;;  %v533_v30 = vld [vmem:[#allocation4 + $0x178] sm:$0xff] }
  0x6f   : > { %1613 = vmatpush3.bf16.msra.mxu1 %v1610_v41  ;;  %v1590_v28 = vpack.c.bf16 %v531_v27, %v530_v26  ;;  %v1594_v31 = vpack.c.bf16 %v533_v30, %v532_v29  ;;  %v657_v33 = vld [vmem:[#allocation6 + $0xd8] sm:$0xff]  ;;  %v658_v35 = vld [vmem:[#allocation6 + $0xe0] sm:$0xff]  ;;  %v659_v36 = vld [vmem:[#allocation6 + $0xe8] sm:$0xff] }
  0x70   : > { %1615 = vmatprep.subr.bf16.mxu1 %v1614_v47  ;;  %v1622_v37 = vpack.c.bf16 %v659_v36, %v658_v35  ;;  %v661_v39 = vld [vmem:[#allocation6 + $0xf8] sm:$0xff]  ;;  %v627_v41 = vld [vmem:[#allocation6] sm:$0xff]  ;;  %v628_v42 = vld [vmem:[#allocation6 + $0x8] sm:$0xff] }
  0x71   : > { %1525 = vmatpush3.bf16.msra.mxu0 %v1522_v21  ;;  %v527_v21 = vld [vmem:[#allocation4 + $0x148] sm:$0xff]  ;;  %v1630_v43 = vpack.c.bf16 %v628_v42, %v627_v41  ;;  %v921_v46 = vld [vmem:[#allocation8 + $0x10] sm:$0xff]  ;;  %v927_v55 = vld [vmem:[#allocation8 + $0x40] sm:$0xff] }
  0x72   : > { %1527 = vmatprep.subr.bf16.mxu0 %v1526_v32  ;;  %v1582_v22 = vpack.c.bf16 %v527_v21, %v526_v20  ;;  %v925_v52 = vld [vmem:[#allocation8 + $0x30] sm:$0xff]  ;;  %v931_v61 = vld [vmem:[#allocation8 + $0x60] sm:$0xff]  ;;  %v632_v17 = vld [vmem:[#allocation6 + $0x28] sm:$0xff] }
  0x73   : > { %1617 = vmatpush3.bf16.msra.mxu1 %v1614_v47  ;;  %v922_v47 = vld [vmem:[#allocation8 + $0x18] sm:$0xff]  ;;  %v929_v58 = vld [vmem:[#allocation8 + $0x50] sm:$0xff]  ;;  %v635_v23 = vld [vmem:[#allocation6 + $0x40] sm:$0xff] }
  0x74   : > { %v933_v0 = vld [vmem:[#allocation8 + $0x70] sm:$0xff]  ;;  %v634_v21 = vld [vmem:[#allocation6 + $0x38] sm:$0xff]  ;;  %v636_v24 = vld [vmem:[#allocation6 + $0x48] sm:$0xff] }
  0x75   : > { %1529 = vmatpush3.bf16.msra.mxu0 %v1526_v32  ;;  %v656_v32 = vld [vmem:[#allocation6 + $0xd0] sm:$0xff]  ;;  %v638_v27 = vld [vmem:[#allocation6 + $0x58] sm:$0xff]  ;;  %v639_v29 = vld [vmem:[#allocation6 + $0x60] sm:$0xff] }
  0x76   : > { %1531 = vmatprep.subr.bf16.mxu0 %v1530_v38  ;;  %v1618_v34 = vpack.c.bf16 %v657_v33, %v656_v32  ;;  %v1124_v3 = vld [vmem:[%s2084_s2] ss:$0 sm:$0xff]  ;;  %v640_v30 = vld [vmem:[#allocation6 + $0x68] sm:$0xff]  ;;  %v642_v33 = vld [vmem:[#allocation6 + $0x78] sm:$0xff] }
  0x77   : > { %v633_v20 = vld [vmem:[#allocation6 + $0x30] sm:$0xff]  ;;  %v815_v35 = vld [vmem:[#allocation6 + $0x100] sm:$0xff]  ;;  %v816_v36 = vld [vmem:[#allocation6 + $0x108] sm:$0xff] }
  0x78   : > { %1619 = vmatprep.subr.bf16.mxu1 %v1618_v34  ;;  %v637_v26 = vld [vmem:[#allocation6 + $0x50] sm:$0xff]  ;;  %v819_v42 = vld [vmem:[#allocation6 + $0x120] sm:$0xff] }
  0x79   : > { %1533 = vmatpush3.bf16.msra.mxu0 %v1530_v38  ;;  %1621 = vmatpush3.bf16.msra.mxu1 %v1618_v34  ;;  %v660_v38 = vld [vmem:[#allocation6 + $0xf0] sm:$0xff] }
  0x7a   : > { %1535 = vmatprep.subr.bf16.mxu0 %v1534_v44  ;;  %1623 = vmatprep.subr.bf16.mxu1 %v1622_v37  ;;  %v1626_v40 = vpack.c.bf16 %v661_v39, %v660_v38  ;;  %v641_v32 = vld [vmem:[#allocation6 + $0x70] sm:$0xff]  ;;  %v818_v39 = vld [vmem:[#allocation6 + $0x118] sm:$0xff] }
  0x7b   : > { %v1658_v34 = vpack.c.bf16 %v642_v33, %v641_v32  ;;  %v817_v38 = vld [vmem:[#allocation6 + $0x110] sm:$0xff] }
  0x7c   : > { %1290 = vmatmul.mubr.f32.vlgmr.msra.gmra.mrb[0].mxu0 %v347_v48  ;;  %v1698_v48 = vpack.c.bf16 %v922_v47, %v921_v46  ;;  %v823_v47 = vld [vmem:[#allocation6 + $0x140] sm:$0xff] }
  0x7d   : > { %1537 = vmatpush3.bf16.msra.mxu0 %v1534_v44  ;;  %1324 = vmatprep.mubr.f32.mxu0 %v328_v50  ;;  %v920_v44 = vld [vmem:[#allocation8 + $0x8] sm:$0xff] }
  0x7e   : > { %1539 = vmatprep.subr.bf16.mxu0 %v1538_v49  ;;  %1625 = vmatpush3.bf16.msra.mxu1 %v1622_v37  ;;  %v924_v50 = vld [vmem:[#allocation8 + $0x28] sm:$0xff]  ;;  %v1662_v37 = vpack.c.bf16 %v816_v36, %v815_v35 }
  0x7f   : > { %1627 = vmatprep.subr.bf16.mxu1 %v1626_v40 }
  0x81   : > { %1541 = vmatpush3.bf16.msra.mxu0 %v1538_v49  ;;  %v923_v49 = vld [vmem:[#allocation8 + $0x20] sm:$0xff] }
  0x82   : > { %1543 = vmatprep.subr.bf16.mxu0 %v1542_v53  ;;  %1629 = vmatpush3.bf16.msra.mxu1 %v1626_v40  ;;  %v1702_v51 = vpack.c.bf16 %v924_v50, %v923_v49  ;;  %v1666_v40 = vpack.c.bf16 %v818_v39, %v817_v38  ;;  %v825_v50 = vld [vmem:[#allocation6 + $0x150] sm:$0xff] }
  0x83   : > { %1631 = vmatprep.subr.bf16.mxu1 %v1630_v43 }
  0x85   : > { %1545 = vmatpush3.bf16.msra.mxu0 %v1542_v53  ;;  %v926_v53 = vld [vmem:[#allocation8 + $0x38] sm:$0xff] }
  0x86   : > { %1547 = vmatprep.subr.bf16.mxu0 %v1546_v56  ;;  %v1706_v54 = vpack.c.bf16 %v926_v53, %v925_v52  ;;  %v827_v53 = vld [vmem:[#allocation6 + $0x160] sm:$0xff] }
  0x89   : > { %1549 = vmatpush3.bf16.msra.mxu0 %v1546_v56  ;;  %v928_v56 = vld [vmem:[#allocation8 + $0x48] sm:$0xff] }
  0x8a   : > { %1551 = vmatprep.subr.bf16.mxu0 %v1550_v59  ;;  %v1710_v57 = vpack.c.bf16 %v928_v56, %v927_v55  ;;  %v829_v56 = vld [vmem:[#allocation6 + $0x170] sm:$0xff] }
  0x8d   : > { %1553 = vmatpush3.bf16.msra.mxu0 %v1550_v59  ;;  %v930_v59 = vld [vmem:[#allocation8 + $0x58] sm:$0xff] }
  0x8e   : > { %1555 = vmatprep.subr.bf16.mxu0 %v1554_v62  ;;  %v1714_v60 = vpack.c.bf16 %v930_v59, %v929_v58 }
  0x91   : > { %1557 = vmatpush3.bf16.msra.mxu0 %v1554_v62  ;;  %v932_v62 = vld [vmem:[#allocation8 + $0x68] sm:$0xff] }
  0x92   : > { %1559 = vmatprep.subr.bf16.mxu0 %v1558_v1  ;;  %v1718_v63 = vpack.c.bf16 %v932_v62, %v931_v61  ;;  %v1125_v61 = vld [vmem:[%s2086_s4] ss:$0 sm:$0xff] }
  0x93   : > { %v1126_v62 = vld [vmem:[%s2088_s6] ss:$0 sm:$0xff] }
  0x95   : > { %1561 = vmatpush3.bf16.msra.mxu0 %v1558_v1  ;;  %v934_v1 = vld [vmem:[#allocation8 + $0x78] sm:$0xff] }
  0x96   : > { %1563 = vmatprep.subr.bf16.mxu0 %v1562_v4  ;;  %v1722_v2 = vpack.c.bf16 %v934_v1, %v933_v0 }
  0x99   : > { %1565 = vmatpush3.bf16.msra.mxu0 %v1562_v4 }
  0x9a   : > { %1567 = vmatprep.subr.bf16.mxu0 %v1566_v7 }
  0x9c   : > { %1325 = vmatmul.mubr.f32.vlgmr.msra.gmra.mrb[0].mxu0 %v329_v11  ;;  %v629_v11 = vld [vmem:[#allocation6 + $0x10] sm:$0xff] }
  0x9d   : > { %1569 = vmatpush3.bf16.msra.mxu0 %v1566_v7  ;;  %1359 = vmatprep.mubr.f32.mxu0 %v2048_v10 }
  0x9e   : > { %1571 = vmatprep.subr.bf16.mxu0 %v1570_v12 }
  0xa1   : > { %1573 = vmatpush3.bf16.msra.mxu0 %v1570_v12  ;;  %v630_v12 = vld [vmem:[#allocation6 + $0x18] sm:$0xff] }
  0xa2   : > { %1575 = vmatprep.subr.bf16.mxu0 %v1574_v16  ;;  %v1634_v15 = vpack.c.bf16 %v630_v12, %v629_v11 }
  0xa5   : > { %1577 = vmatpush3.bf16.msra.mxu0 %v1574_v16  ;;  %v631_v16 = vld [vmem:[#allocation6 + $0x20] sm:$0xff] }
  0xa6   : > { %1579 = vmatprep.subr.bf16.mxu0 %v1578_v19 }
  0xa9   : > { %1581 = vmatpush3.bf16.msra.mxu0 %v1578_v19  ;;  %v1638_v19 = vpack.c.bf16 %v632_v17, %v631_v16 }
  0xaa   : > { %1583 = vmatprep.subr.bf16.mxu0 %v1582_v22 }
  0xad   : > { %1585 = vmatpush3.bf16.msra.mxu0 %v1582_v22  ;;  %v1642_v22 = vpack.c.bf16 %v634_v21, %v633_v20 }
  0xae   : > { %1587 = vmatprep.subr.bf16.mxu0 %v1586_v25 }
  0xb1   : > { %1589 = vmatpush3.bf16.msra.mxu0 %v1586_v25  ;;  %v1646_v25 = vpack.c.bf16 %v636_v24, %v635_v23 }
  0xb2   : > { %1591 = vmatprep.subr.bf16.mxu0 %v1590_v28 }
  0xb5   : > { %1593 = vmatpush3.bf16.msra.mxu0 %v1590_v28  ;;  %v1650_v28 = vpack.c.bf16 %v638_v27, %v637_v26 }
  0xb6   : > { %1595 = vmatprep.subr.bf16.mxu0 %v1594_v31 }
  0xb9   : > { %1597 = vmatpush3.bf16.msra.mxu0 %v1594_v31  ;;  %v1654_v31 = vpack.c.bf16 %v640_v30, %v639_v29 }
  0xbc   : > { %1360 = vmatmul.mubr.f32.vlgmr.msra.gmra.mrb[0].mxu0 %v2051_v13 }
  0xbd   : > { %1499 = vmatprep.mubr.f32.mxu0 %v2048_v10  ;;  %v919_v10 = vld [vmem:[#allocation8] sm:$0xff] }
  0xbe   : > { %v1694_v45 = vpack.c.bf16 %v920_v44, %v919_v10  ;;  %v821_v44 = vld [vmem:[#allocation6 + $0x130] sm:$0xff] }
  0xc0   : > { %1695 = vmatprep.subr.bf16.mxu0 %v1694_v45 }
  0xc1   : > { %1697 = vmatpush3.bf16.msra.mxu0 %v1694_v45  ;;  %v822_v45 = vld [vmem:[#allocation6 + $0x138] sm:$0xff] }
  0xc2   : > { %1699 = vmatprep.subr.bf16.mxu0 %v1698_v48  ;;  %v1674_v46 = vpack.c.bf16 %v822_v45, %v821_v44 }
  0xc5   : > { %1701 = vmatpush3.bf16.msra.mxu0 %v1698_v48  ;;  %v824_v48 = vld [vmem:[#allocation6 + $0x148] sm:$0xff] }
  0xc6   : > { %1703 = vmatprep.subr.bf16.mxu0 %v1702_v51  ;;  %v1678_v49 = vpack.c.bf16 %v824_v48, %v823_v47 }
  0xc9   : > { %1705 = vmatpush3.bf16.msra.mxu0 %v1702_v51  ;;  %v826_v51 = vld [vmem:[#allocation6 + $0x158] sm:$0xff] }
  0xca   : > { %1707 = vmatprep.subr.bf16.mxu0 %v1706_v54  ;;  %v1682_v52 = vpack.c.bf16 %v826_v51, %v825_v50 }
  0xcd   : > { %1709 = vmatpush3.bf16.msra.mxu0 %v1706_v54  ;;  %v828_v54 = vld [vmem:[#allocation6 + $0x168] sm:$0xff] }
  0xce   : > { %1711 = vmatprep.subr.bf16.mxu0 %v1710_v57  ;;  %v1686_v55 = vpack.c.bf16 %v828_v54, %v827_v53 }
  0xd1   : > { %1713 = vmatpush3.bf16.msra.mxu0 %v1710_v57  ;;  %v830_v57 = vld [vmem:[#allocation6 + $0x178] sm:$0xff] }
  0xd2   : > { %1715 = vmatprep.subr.bf16.mxu0 %v1714_v60  ;;  %v1690_v58 = vpack.c.bf16 %v830_v57, %v829_v56 }
  0xd5   : > { %1717 = vmatpush3.bf16.msra.mxu0 %v1714_v60 }
  0xd6   : > { %1719 = vmatprep.subr.bf16.mxu0 %v1718_v63 }
  0xd9   : > { %1721 = vmatpush3.bf16.msra.mxu0 %v1718_v63 }
  0xda   : > { %1723 = vmatprep.subr.bf16.mxu0 %v1722_v2 }
  0xdd   : > { %1725 = vmatpush3.bf16.msra.mxu0 %v1722_v2 }
  0xe0   : > { %1500 = vmatmul.mubr.f32.vlgmr.msra.gmra.mrb[2].mxu0 %v2051_v13 }
 0x18f   : > { %v1361_v4 = vpop.f32.mrb[0].mxu0 }
 0x190   : > { %v2061_v5 = vadd.f32 %v1361_v4, %v1124_v3  ;;  %v600_v6 = vpop.f32.mrb[1].mxu0 }
 0x191   : > { %v618_v7 = vadd.f32 %v1124_v3, %v600_v6 }
 0x192   : > { %v621_v8 = vmax.f32 %v2061_v5, 0.0 }
 0x193   : > { %v620_v9 = vmax.f32 %v618_v7, 0.0 }
 0x194   : > { %624 = vst [vmem:[#allocation3 + $0xa] sm:$0xff] %v621_v8 }
 0x195   : > { %623 = vst [vmem:[#allocation3 + $0x2] sm:$0xff] %v620_v9 }
 0x19c   : > { %v643_v14 = vld [vmem:[#allocation3 + $0x1] sm:$0xff]  ;;  %v644_v13 = vld [vmem:[#allocation3 + $0x9] sm:$0xff] }
 0x19d   : > { %1394 = vmatprep.mubr.f32.mxu1 %v643_v14  ;;  %v625_v18 = vld [vmem:[#allocation3] sm:$0xff]  ;;  %v626_v41 = vld [vmem:[#allocation3 + $0x8] sm:$0xff] }
 0x19e   : > { %1395 = vmatmul.mubr.f32.vlgmr.msra.gmra.mrb[0].mxu1 %v644_v13 }
 0x19f   : > { %1633 = vmatpush3.bf16.msra.mxu1 %v1630_v43  ;;  %1429 = vmatprep.mubr.f32.mxu1 %v625_v18  ;;  %v820_v43 = vld [vmem:[#allocation6 + $0x128] sm:$0xff] }
 0x1a0   : > { %1635 = vmatprep.subr.bf16.mxu1 %v1634_v15  ;;  %v1670_v10 = vpack.c.bf16 %v820_v43, %v819_v42 }
 0x1a3   : > { %1637 = vmatpush3.bf16.msra.mxu1 %v1634_v15 }
 0x1a4   : > { %1639 = vmatprep.subr.bf16.mxu1 %v1638_v19 }
 0x1a7   : > { %1641 = vmatpush3.bf16.msra.mxu1 %v1638_v19 }
 0x1a8   : > { %1643 = vmatprep.subr.bf16.mxu1 %v1642_v22 }
 0x1ab   : > { %1645 = vmatpush3.bf16.msra.mxu1 %v1642_v22 }
 0x1ac   : > { %1647 = vmatprep.subr.bf16.mxu1 %v1646_v25 }
 0x1af   : > { %1649 = vmatpush3.bf16.msra.mxu1 %v1646_v25 }
 0x1b0   : > { %1651 = vmatprep.subr.bf16.mxu1 %v1650_v28 }
 0x1b3   : > { %1653 = vmatpush3.bf16.msra.mxu1 %v1650_v28  ;;  %v1501_v59 = vpop.f32.mrb[2].mxu0 }
 0x1b4   : > { %1655 = vmatprep.subr.bf16.mxu1 %v1654_v31  ;;  %v1008_v60 = vpop.f32.mrb[3].mxu0  ;;  %v1014_v2 = vadd.f32 %v1501_v59, %v1126_v62 }
 0x1b5   : > { %v1009_v4 = vadd.f32 %v1126_v62, %v1008_v60 }
 0x1b7   : > { %1657 = vmatpush3.bf16.msra.mxu1 %v1654_v31 }
 0x1b8   : > { %1659 = vmatprep.subr.bf16.mxu1 %v1658_v34 }
 0x1bb   : > { %1661 = vmatpush3.bf16.msra.mxu1 %v1658_v34 }
 0x1bc   : > { %1663 = vmatprep.subr.bf16.mxu1 %v1662_v37 }
 0x1be   : > { %1430 = vmatmul.mubr.f32.vlgmr.msra.gmra.mrb[0].mxu1 %v626_v41 }
 0x1bf   : > { %1665 = vmatpush3.bf16.msra.mxu1 %v1662_v37  ;;  %1464 = vmatprep.mubr.f32.mxu1 %v620_v9 }
 0x1c0   : > { %1667 = vmatprep.subr.bf16.mxu1 %v1666_v40 }
 0x1c3   : > { %1669 = vmatpush3.bf16.msra.mxu1 %v1666_v40 }
 0x1c4   : > { %1671 = vmatprep.subr.bf16.mxu1 %v1670_v10 }
 0x1c7   : > { %1673 = vmatpush3.bf16.msra.mxu1 %v1670_v10 }
 0x1c8   : > { %1675 = vmatprep.subr.bf16.mxu1 %v1674_v46 }
 0x1cb   : > { %1677 = vmatpush3.bf16.msra.mxu1 %v1674_v46 }
 0x1cc   : > { %1679 = vmatprep.subr.bf16.mxu1 %v1678_v49 }
 0x1cf   : > { %1681 = vmatpush3.bf16.msra.mxu1 %v1678_v49 }
 0x1d0   : > { %1683 = vmatprep.subr.bf16.mxu1 %v1682_v52 }
 0x1d3   : > { %1685 = vmatpush3.bf16.msra.mxu1 %v1682_v52 }
 0x1d4   : > { %1687 = vmatprep.subr.bf16.mxu1 %v1686_v55 }
 0x1d7   : > { %1689 = vmatpush3.bf16.msra.mxu1 %v1686_v55 }
 0x1d8   : > { %1691 = vmatprep.subr.bf16.mxu1 %v1690_v58 }
 0x1db   : > { %1693 = vmatpush3.bf16.msra.mxu1 %v1690_v58 }
 0x1de   : > { %1465 = vmatmul.mubr.f32.vlgmr.msra.gmra.mrb[0].mxu1 %v621_v8 }
 0x2b1   : > { %v1466_v63 = vpop.f32.mrb[0].mxu1 }
 0x2b2   : > { %v916_v0 = vadd.f32 %v1466_v63, %v1125_v61  ;;  %v897_v1 = vpop.f32.mrb[1].mxu1 }
 0x2b3   : > { %v915_v3 = vadd.f32 %v1125_v61, %v897_v1 }
 0x2b4   : > { %v918_v6 = vmax.f32 %v916_v0, 0.0 }
 0x2b5   : > { %v917_v7 = vmax.f32 %v915_v3, 0.0 }
 0x2b6   : > { %v1018_v5 = vadd.f32 %v1014_v2, %v918_v6 }
 0x2b7   : > { %v1017_v8 = vadd.f32 %v1009_v4, %v917_v7 }
 0x2b8   : > { %v1020_v9 = vmax.f32 %v1018_v5, 0.0 }
 0x2b9   : > { %v1019_v11 = vmax.f32 %v1017_v8, 0.0 }
 0x2ba   : > { %1022 = vst [vmem:[%s322_s19 + $0x8] sm:$0xff] %v1020_v9 }
 0x2bb   : > { %1021 = vst [vmem:[%s322_s19] sm:$0xff] %v1019_v11 }
 0x2bc PF: > { %s19_s24 = sadd.s32 1, %s1874_s24  }
 0x2bd   : > { %p16_p5 = scmp.ge.s32.totalorder %s19_s24, 4  }
 0x2bf   :  { %18 = sbr.rel (!%p16_p5) target bundleno = 2 (0x2), region = 95 }
 0x2c6   :  { %1044 = vsyncpa [#allocation5], 1 }
 0x2c7   :  { %1046 = vsyncpa [#allocation5 + $0x1], 1 }
 0x2c8   :  { %1047 = vsyncpa [#allocation7], 1 }

</bundles_post_ra>
